<compile_context>
chip_gen: v7x
topology: tpu7x:2x2x1
jax: 0.10.0
libtpu: 0.0.40
codegen_flags: <defaults>
</compile_context>

<pallas_src>
import numpy as np
import jax
import jax.numpy as jnp
from jax import lax
from jax.experimental import pallas as pl
from jax.experimental.pallas import tpu as pltpu


def bigru_kernel(x_ref, wi_ref, wbd_ref, bgi_ref, bhn_ref, h0_ref, out_ref, gi_ref):
    # x_ref   : (T*B, 2D)  cols 0:D = x at time s (forward stream),
    #                      cols D:2D = x at time T-1-s (time-reversed stream)
    # wi_ref  : (2D, 6H)   fused input weights (off-diagonal blocks exactly zero)
    # wbd_ref : (2H, 6H)   block-diagonal hidden weights (fwd rows 0:H, bwd rows H:2H)
    # bgi_ref : (1, 6H)    b_i with the hidden r/z biases pre-folded in
    # bhn_ref : (1, 2H)    [b_hn_fwd | b_hn_bwd]  (stays inside r * (...))
    # h0_ref  : (B, 2H)    [h0_fwd | h0_bwd]
    # out_ref : (T, B, 2H) forward half in [..., :H], backward half in [..., H:]
    # gi_ref  : (T*B, 6H)  f32 VMEM scratch for the hoisted input projections
    T, B, H2 = out_ref.shape
    H = H2 // 2
    H4 = 4 * H

    # Hoisted fused input projection: ONE MXU op for both directions and all gates,
    # biases (including folded b_h r/z) added once, result parked in VMEM.
    gi_ref[...] = (
        jnp.dot(x_ref[...], wi_ref[...], preferred_element_type=jnp.float32)
        + bgi_ref[...])

    w_bd = wbd_ref[...]                                   # (2H, 6H)
    b_hn = jnp.broadcast_to(bhn_ref[...], (B, H2))        # hoisted broadcast (once)
    h = h0_ref[...]                                       # (B, 2H), carried in vregs

    # Fused, fully unrolled time loop: one (B,2H)x(2H,6H) matmul per step covers
    # both directions; gate math runs at 2H lane density.
    for s in range(T):                                    # static indices, T small
        gi = gi_ref[s * B:(s + 1) * B, :]                 # (B, 6H), static slice
        gh = jnp.dot(h, w_bd, preferred_element_type=jnp.float32)   # (B, 6H)
        # PyTorch GRU equations, gate order (r, z, n); r/z in one lane-full sigmoid slab.
        rz = jax.nn.sigmoid(gi[:, :H4] + gh[:, :H4])      # (B, 4H) = [r_f r_b z_f z_b]
        r = rz[:, :H2]
        z = rz[:, H2:]
        n = jnp.tanh(gi[:, H4:] + r * (gh[:, H4:] + b_hn))
        h = (1.0 - z) * n + z * h
        out_ref[s, :, :H] = h[:, :H].astype(out_ref.dtype)            # fwd @ time s
        out_ref[T - 1 - s, :, H:] = h[:, H:].astype(out_ref.dtype)    # bwd @ time T-1-s


def _fused_gru_operands(x, p):
    """Build the fused / column-permuted operands the kernel expects (tiny XLA prep)."""
    T, B, D = x.shape
    H = p["w_h"].shape[-1] // 3
    f32 = jnp.float32

    # Forward stream and time-reversed stream side by side -> one hoisted matmul
    # produces gi rows whose bwd columns are already time-reversed.
    x_cat = jnp.concatenate([x, x[::-1]], axis=-1).reshape(T * B, 2 * D).astype(f32)

    def gates(w, d):                       # (.., 3H) -> (r, z, n) blocks of width H
        return w[d, ..., :H], w[d, ..., H:2 * H], w[d, ..., 2 * H:]

    wi_fr, wi_fz, wi_fn = gates(p["w_i"], 0)
    wi_br, wi_bz, wi_bn = gates(p["w_i"], 1)
    wh_fr, wh_fz, wh_fn = gates(p["w_h"], 0)
    wh_br, wh_bz, wh_bn = gates(p["w_h"], 1)
    bi_fr, bi_fz, bi_fn = gates(p["b_i"], 0)
    bi_br, bi_bz, bi_bn = gates(p["b_i"], 1)
    bh_fr, bh_fz, bh_fn = gates(p["b_h"], 0)
    bh_br, bh_bz, bh_bn = gates(p["b_h"], 1)

    zD = jnp.zeros((D, H), f32)
    zH = jnp.zeros((H, H), f32)
    # Gate-major / direction-minor column layout: [r_f r_b z_f z_b n_f n_b].
    wi_cat = jnp.concatenate([
        jnp.concatenate([wi_fr, zD, wi_fz, zD, wi_fn, zD], axis=1),   # rows for fwd-time x
        jnp.concatenate([zD, wi_br, zD, wi_bz, zD, wi_bn], axis=1),   # rows for rev-time x
    ], axis=0)                                                        # (2D, 6H)
    w_bd = jnp.concatenate([
        jnp.concatenate([wh_fr, zH, wh_fz, zH, wh_fn, zH], axis=1),   # h_fwd rows
        jnp.concatenate([zH, wh_br, zH, wh_bz, zH, wh_bn], axis=1),   # h_bwd rows
    ], axis=0)                                                        # (2H, 6H)
    # Hidden r/z biases pre-folded into the hoisted projection (off the serial chain).
    b_gi = jnp.concatenate([bi_fr + bh_fr, bi_br + bh_br,
                            bi_fz + bh_fz, bi_bz + bh_bz,
                            bi_fn, bi_bn], axis=1)                    # (1, 6H)
    b_hn = jnp.concatenate([bh_fn, bh_bn], axis=1)                    # (1, 2H)
    h0 = jnp.concatenate([p["h0"][0], p["h0"][1]], axis=1)            # (B, 2H)
    return x_cat, wi_cat, w_bd, b_gi, b_hn, h0


def bigru_att_forward(x, params):
    """Pallas implementation of BiGru_Att.forward. x: (T, B, D) -> (T, B, 2*H)."""
    T, B, _ = x.shape
    H = params["w_h"].shape[-1] // 3
    operands = _fused_gru_operands(x, params)

    vmem = pl.BlockSpec(memory_space=pltpu.MemorySpace.VMEM)
    return pl.pallas_call(
        bigru_kernel,
        out_shape=jax.ShapeDtypeStruct((T, B, 2 * H), jnp.float32),
        in_specs=[vmem] * 6,
        out_specs=vmem,
        scratch_shapes=[pltpu.VMEM((T * B, 6 * H), jnp.float32)],
    )(*operands)


def gru_reference(x, p):
    """Pure-JAX reference (same semantics as torch.nn.GRU bidirectional forward)."""
    H = p["w_h"].shape[-1] // 3
    outs = []
    for d, rev in ((0, False), (1, True)):
        w_i, w_h = p["w_i"][d], p["w_h"][d]
        b_i, b_h = p["b_i"][d][0], p["b_h"][d][0]
        h0 = p["h0"][d]
        xs = x[::-1] if rev else x

        def step(h, x_t):
            gi = x_t @ w_i + b_i
            gh = h @ w_h + b_h
            r = jax.nn.sigmoid(gi[:, :H] + gh[:, :H])
            z = jax.nn.sigmoid(gi[:, H:2 * H] + gh[:, H:2 * H])
            n = jnp.tanh(gi[:, 2 * H:] + r * gh[:, 2 * H:])
            h_new = (1.0 - z) * n + z * h
            return h_new, h_new

        _, hs = lax.scan(step, h0, xs)
        if rev:
            hs = hs[::-1]
        outs.append(hs)
    return jnp.concatenate(outs, axis=-1)


def init_params(key, D, H, B):
    """Deterministic init in the per-direction torch.nn.GRU layout.

    Mapping from torch.nn.GRU(input_size=D, hidden_size=H, bidirectional=True):
      w_i[d] = weight_ih_l0{_reverse}.T      (D, 3H), gate order (r, z, n)
      w_h[d] = weight_hh_l0{_reverse}.T      (H, 3H)
      b_i[d] = bias_ih_l0{_reverse}[None, :] (1, 3H)
      b_h[d] = bias_hh_l0{_reverse}[None, :] (1, 3H)
      h0     = the module's `hidden` Parameter: zeros(2, max_length, H)
    """
    ks = jax.random.split(key, 4)
    s = 1.0 / float(np.sqrt(H))
    u = lambda k, shape: jax.random.uniform(k, shape, jnp.float32, -s, s)
    return dict(
        w_i=u(ks[0], (2, D, 3 * H)),
        w_h=u(ks[1], (2, H, 3 * H)),
        b_i=u(ks[2], (2, 1, 3 * H)),
        b_h=u(ks[3], (2, 1, 3 * H)),
        h0=jnp.zeros((2, B, H), jnp.float32),
    )


if __name__ == "__main__":
    # config: input_dim=8, encoder_output_dim=64 (-> H=32), max_length=16 (== batch)
    T, B, D = 8, 16, 8
    H = 32

    key = jax.random.PRNGKey(0)
    k_x, k_p = jax.random.split(key)
    x = jax.random.normal(k_x, (T, B, D), jnp.float32)
    params = init_params(k_p, D, H, B)

    out = jax.block_until_ready(bigru_att_forward(x, params))
    assert out.shape == (T, B, 2 * H), out.shape

    ref = jax.block_until_ready(gru_reference(x, params))
    np.testing.assert_allclose(np.asarray(out), np.asarray(ref), rtol=2e-3, atol=2e-3)

    print("KERNEL_OK")
</pallas_src>

<mosaic_0001>
module attributes {stable_mosaic.version = 11 : i64} {
  func.func @bigru_kernel(%arg0: memref<128x16xf32, #tpu.memory_space<vmem>>, %arg1: memref<16x192xf32, #tpu.memory_space<vmem>>, %arg2: memref<64x192xf32, #tpu.memory_space<vmem>>, %arg3: memref<1x192xf32, #tpu.memory_space<vmem>>, %arg4: memref<1x64xf32, #tpu.memory_space<vmem>>, %arg5: memref<16x64xf32, #tpu.memory_space<vmem>>, %arg6: memref<8x16x64xf32, #tpu.memory_space<vmem>>, %arg7: memref<128x192xf32, #tpu.memory_space<vmem>>) attributes {dimension_semantics = [], scalar_prefetch = 0 : i64, scratch_operands = 1 : i64, tpu.core_type = #tpu.core_type<tc>} {
    %c0 = arith.constant 0 : index
    %c0_0 = arith.constant 0 : index
    %0 = vector.load %arg0[%c0, %c0_0] : memref<128x16xf32, #tpu.memory_space<vmem>>, vector<128x16xf32>
    %c0_1 = arith.constant 0 : index
    %c0_2 = arith.constant 0 : index
    %1 = vector.load %arg1[%c0_1, %c0_2] : memref<16x192xf32, #tpu.memory_space<vmem>>, vector<16x192xf32>
    %cst = arith.constant dense<0.000000e+00> : vector<128x192xf32>
    %2 = tpu.matmul %0, %1, %cst {dimension_numbers = #tpu.dot_dimension_numbers<[1], [0], [0], [1], [0, 0, 1, 1], [], []>} : vector<128x16xf32>, vector<16x192xf32>, vector<128x192xf32> -> vector<128x192xf32>
    %c0_3 = arith.constant 0 : index
    %c0_4 = arith.constant 0 : index
    %3 = vector.load %arg3[%c0_3, %c0_4] : memref<1x192xf32, #tpu.memory_space<vmem>>, vector<1x192xf32>
    %4 = vector.broadcast %3 : vector<1x192xf32> to vector<128x192xf32>
    %5 = arith.addf %2, %4 : vector<128x192xf32>
    %c0_5 = arith.constant 0 : index
    %c0_6 = arith.constant 0 : index
    %6 = vector.load %arg7[%c0_5, %c0_6] : memref<128x192xf32, #tpu.memory_space<vmem>>, vector<128x192xf32>
    tpu.vector_store %arg7[%c0_5, %c0_6], %5 {strides = array<i32>} : memref<128x192xf32, #tpu.memory_space<vmem>>, vector<128x192xf32>,
    %c0_7 = arith.constant 0 : index
    %c0_8 = arith.constant 0 : index
    %7 = vector.load %arg2[%c0_7, %c0_8] : memref<64x192xf32, #tpu.memory_space<vmem>>, vector<64x192xf32>
    %c0_9 = arith.constant 0 : index
    %c0_10 = arith.constant 0 : index
    %8 = vector.load %arg4[%c0_9, %c0_10] : memref<1x64xf32, #tpu.memory_space<vmem>>, vector<1x64xf32>
    %9 = vector.shape_cast %8 : vector<1x64xf32> to vector<1x64xf32>
    %10 = vector.broadcast %9 : vector<1x64xf32> to vector<16x64xf32>
    %c0_11 = arith.constant 0 : index
    %c0_12 = arith.constant 0 : index
    %11 = vector.load %arg5[%c0_11, %c0_12] : memref<16x64xf32, #tpu.memory_space<vmem>>, vector<16x64xf32>
    %c0_13 = arith.constant 0 : index
    %c0_14 = arith.constant 0 : index
    %12 = vector.load %arg7[%c0_13, %c0_14] : memref<128x192xf32, #tpu.memory_space<vmem>>, vector<16x192xf32>
    %cst_15 = arith.constant dense<0.000000e+00> : vector<16x192xf32>
    %13 = tpu.matmul %11, %7, %cst_15 {dimension_numbers = #tpu.dot_dimension_numbers<[1], [0], [0], [1], [0, 0, 1, 1], [], []>} : vector<16x64xf32>, vector<64x192xf32>, vector<16x192xf32> -> vector<16x192xf32>
    %14 = vector.extract_strided_slice %12 {offsets = [0, 0], sizes = [16, 128], strides = [1, 1]} : vector<16x192xf32> to vector<16x128xf32>
    %15 = vector.extract_strided_slice %13 {offsets = [0, 0], sizes = [16, 128], strides = [1, 1]} : vector<16x192xf32> to vector<16x128xf32>
    %16 = arith.addf %14, %15 : vector<16x128xf32>
    %17 = arith.negf %16 : vector<16x128xf32>
    %18 = math.exp %17 : vector<16x128xf32>
    %cst_16 = arith.constant 1.000000e+00 : f32
    %19 = vector.broadcast %cst_16 : f32 to vector<16x128xf32>
    %20 = arith.addf %19, %18 : vector<16x128xf32>
    %21 = arith.divf %19, %20 : vector<16x128xf32>
    %22 = vector.extract_strided_slice %21 {offsets = [0, 0], sizes = [16, 64], strides = [1, 1]} : vector<16x128xf32> to vector<16x64xf32>
    %23 = vector.extract_strided_slice %21 {offsets = [0, 64], sizes = [16, 64], strides = [1, 1]} : vector<16x128xf32> to vector<16x64xf32>
    %24 = vector.extract_strided_slice %12 {offsets = [0, 128], sizes = [16, 64], strides = [1, 1]} : vector<16x192xf32> to vector<16x64xf32>
    %25 = vector.extract_strided_slice %13 {offsets = [0, 128], sizes = [16, 64], strides = [1, 1]} : vector<16x192xf32> to vector<16x64xf32>
    %26 = arith.addf %25, %10 : vector<16x64xf32>
    %27 = arith.mulf %22, %26 : vector<16x64xf32>
    %28 = arith.addf %24, %27 : vector<16x64xf32>
    %29 = math.tanh %28 : vector<16x64xf32>
    %cst_17 = arith.constant 1.000000e+00 : f32
    %30 = vector.broadcast %cst_17 : f32 to vector<16x64xf32>
    %31 = arith.subf %30, %23 : vector<16x64xf32>
    %32 = arith.mulf %31, %29 : vector<16x64xf32>
    %33 = arith.mulf %23, %11 : vector<16x64xf32>
    %34 = arith.addf %32, %33 : vector<16x64xf32>
    %35 = vector.extract_strided_slice %34 {offsets = [0, 0], sizes = [16, 32], strides = [1, 1]} : vector<16x64xf32> to vector<16x32xf32>
    %c0_18 = arith.constant 0 : index
    %c0_19 = arith.constant 0 : index
    %c0_20 = arith.constant 0 : index
    %36 = vector.load %arg6[%c0_18, %c0_19, %c0_20] : memref<8x16x64xf32, #tpu.memory_space<vmem>>, vector<1x16x32xf32>
    %37 = vector.shape_cast %36 : vector<1x16x32xf32> to vector<16x32xf32>
    %38 = vector.shape_cast %35 : vector<16x32xf32> to vector<1x16x32xf32>
    tpu.vector_store %arg6[%c0_18, %c0_19, %c0_20], %38 {strides = array<i32>} : memref<8x16x64xf32, #tpu.memory_space<vmem>>, vector<1x16x32xf32>,
    %39 = vector.extract_strided_slice %34 {offsets = [0, 32], sizes = [16, 32], strides = [1, 1]} : vector<16x64xf32> to vector<16x32xf32>
    %c7 = arith.constant 7 : index
    %c0_21 = arith.constant 0 : index
    %c32 = arith.constant 32 : index
    %40 = vector.load %arg6[%c7, %c0_21, %c32] : memref<8x16x64xf32, #tpu.memory_space<vmem>>, vector<1x16x32xf32>
    %41 = vector.shape_cast %40 : vector<1x16x32xf32> to vector<16x32xf32>
    %42 = vector.shape_cast %39 : vector<16x32xf32> to vector<1x16x32xf32>
    tpu.vector_store %arg6[%c7, %c0_21, %c32], %42 {strides = array<i32>} : memref<8x16x64xf32, #tpu.memory_space<vmem>>, vector<1x16x32xf32>,
    %c16 = arith.constant 16 : index
    %c0_22 = arith.constant 0 : index
    %43 = vector.load %arg7[%c16, %c0_22] : memref<128x192xf32, #tpu.memory_space<vmem>>, vector<16x192xf32>
    %cst_23 = arith.constant dense<0.000000e+00> : vector<16x192xf32>
    %44 = tpu.matmul %34, %7, %cst_23 {dimension_numbers = #tpu.dot_dimension_numbers<[1], [0], [0], [1], [0, 0, 1, 1], [], []>} : vector<16x64xf32>, vector<64x192xf32>, vector<16x192xf32> -> vector<16x192xf32>
    %45 = vector.extract_strided_slice %43 {offsets = [0, 0], sizes = [16, 128], strides = [1, 1]} : vector<16x192xf32> to vector<16x128xf32>
    %46 = vector.extract_strided_slice %44 {offsets = [0, 0], sizes = [16, 128], strides = [1, 1]} : vector<16x192xf32> to vector<16x128xf32>
    %47 = arith.addf %45, %46 : vector<16x128xf32>
    %48 = arith.negf %47 : vector<16x128xf32>
    %49 = math.exp %48 : vector<16x128xf32>
    %cst_24 = arith.constant 1.000000e+00 : f32
    %50 = vector.broadcast %cst_24 : f32 to vector<16x128xf32>
    %51 = arith.addf %50, %49 : vector<16x128xf32>
    %52 = arith.divf %50, %51 : vector<16x128xf32>
    %53 = vector.extract_strided_slice %52 {offsets = [0, 0], sizes = [16, 64], strides = [1, 1]} : vector<16x128xf32> to vector<16x64xf32>
    %54 = vector.extract_strided_slice %52 {offsets = [0, 64], sizes = [16, 64], strides = [1, 1]} : vector<16x128xf32> to vector<16x64xf32>
    %55 = vector.extract_strided_slice %43 {offsets = [0, 128], sizes = [16, 64], strides = [1, 1]} : vector<16x192xf32> to vector<16x64xf32>
    %56 = vector.extract_strided_slice %44 {offsets = [0, 128], sizes = [16, 64], strides = [1, 1]} : vector<16x192xf32> to vector<16x64xf32>
    %57 = arith.addf %56, %10 : vector<16x64xf32>
    %58 = arith.mulf %53, %57 : vector<16x64xf32>
    %59 = arith.addf %55, %58 : vector<16x64xf32>
    %60 = math.tanh %59 : vector<16x64xf32>
    %cst_25 = arith.constant 1.000000e+00 : f32
    %61 = vector.broadcast %cst_25 : f32 to vector<16x64xf32>
    %62 = arith.subf %61, %54 : vector<16x64xf32>
    %63 = arith.mulf %62, %60 : vector<16x64xf32>
    %64 = arith.mulf %54, %34 : vector<16x64xf32>
    %65 = arith.addf %63, %64 : vector<16x64xf32>
    %66 = vector.extract_strided_slice %65 {offsets = [0, 0], sizes = [16, 32], strides = [1, 1]} : vector<16x64xf32> to vector<16x32xf32>
    %c1 = arith.constant 1 : index
    %c0_26 = arith.constant 0 : index
    %c0_27 = arith.constant 0 : index
    %67 = vector.load %arg6[%c1, %c0_26, %c0_27] : memref<8x16x64xf32, #tpu.memory_space<vmem>>, vector<1x16x32xf32>
    %68 = vector.shape_cast %67 : vector<1x16x32xf32> to vector<16x32xf32>
    %69 = vector.shape_cast %66 : vector<16x32xf32> to vector<1x16x32xf32>
    tpu.vector_store %arg6[%c1, %c0_26, %c0_27], %69 {strides = array<i32>} : memref<8x16x64xf32, #tpu.memory_space<vmem>>, vector<1x16x32xf32>,
    %70 = vector.extract_strided_slice %65 {offsets = [0, 32], sizes = [16, 32], strides = [1, 1]} : vector<16x64xf32> to vector<16x32xf32>
    %c6 = arith.constant 6 : index
    %c0_28 = arith.constant 0 : index
    %c32_29 = arith.constant 32 : index
    %71 = vector.load %arg6[%c6, %c0_28, %c32_29] : memref<8x16x64xf32, #tpu.memory_space<vmem>>, vector<1x16x32xf32>
    %72 = vector.shape_cast %71 : vector<1x16x32xf32> to vector<16x32xf32>
    %73 = vector.shape_cast %70 : vector<16x32xf32> to vector<1x16x32xf32>
    tpu.vector_store %arg6[%c6, %c0_28, %c32_29], %73 {strides = array<i32>} : memref<8x16x64xf32, #tpu.memory_space<vmem>>, vector<1x16x32xf32>,
    %c32_30 = arith.constant 32 : index
    %c0_31 = arith.constant 0 : index
    %74 = vector.load %arg7[%c32_30, %c0_31] : memref<128x192xf32, #tpu.memory_space<vmem>>, vector<16x192xf32>
    %cst_32 = arith.constant dense<0.000000e+00> : vector<16x192xf32>
    %75 = tpu.matmul %65, %7, %cst_32 {dimension_numbers = #tpu.dot_dimension_numbers<[1], [0], [0], [1], [0, 0, 1, 1], [], []>} : vector<16x64xf32>, vector<64x192xf32>, vector<16x192xf32> -> vector<16x192xf32>
    %76 = vector.extract_strided_slice %74 {offsets = [0, 0], sizes = [16, 128], strides = [1, 1]} : vector<16x192xf32> to vector<16x128xf32>
    %77 = vector.extract_strided_slice %75 {offsets = [0, 0], sizes = [16, 128], strides = [1, 1]} : vector<16x192xf32> to vector<16x128xf32>
    %78 = arith.addf %76, %77 : vector<16x128xf32>
    %79 = arith.negf %78 : vector<16x128xf32>
    %80 = math.exp %79 : vector<16x128xf32>
    %cst_33 = arith.constant 1.000000e+00 : f32
    %81 = vector.broadcast %cst_33 : f32 to vector<16x128xf32>
    %82 = arith.addf %81, %80 : vector<16x128xf32>
    %83 = arith.divf %81, %82 : vector<16x128xf32>
    %84 = vector.extract_strided_slice %83 {offsets = [0, 0], sizes = [16, 64], strides = [1, 1]} : vector<16x128xf32> to vector<16x64xf32>
    %85 = vector.extract_strided_slice %83 {offsets = [0, 64], sizes = [16, 64], strides = [1, 1]} : vector<16x128xf32> to vector<16x64xf32>
    %86 = vector.extract_strided_slice %74 {offsets = [0, 128], sizes = [16, 64], strides = [1, 1]} : vector<16x192xf32> to vector<16x64xf32>
    %87 = vector.extract_strided_slice %75 {offsets = [0, 128], sizes = [16, 64], strides = [1, 1]} : vector<16x192xf32> to vector<16x64xf32>
    %88 = arith.addf %87, %10 : vector<16x64xf32>
    %89 = arith.mulf %84, %88 : vector<16x64xf32>
    %90 = arith.addf %86, %89 : vector<16x64xf32>
    %91 = math.tanh %90 : vector<16x64xf32>
    %cst_34 = arith.constant 1.000000e+00 : f32
    %92 = vector.broadcast %cst_34 : f32 to vector<16x64xf32>
    %93 = arith.subf %92, %85 : vector<16x64xf32>
    %94 = arith.mulf %93, %91 : vector<16x64xf32>
    %95 = arith.mulf %85, %65 : vector<16x64xf32>
    %96 = arith.addf %94, %95 : vector<16x64xf32>
    %97 = vector.extract_strided_slice %96 {offsets = [0, 0], sizes = [16, 32], strides = [1, 1]} : vector<16x64xf32> to vector<16x32xf32>
    %c2 = arith.constant 2 : index
    %c0_35 = arith.constant 0 : index
    %c0_36 = arith.constant 0 : index
    %98 = vector.load %arg6[%c2, %c0_35, %c0_36] : memref<8x16x64xf32, #tpu.memory_space<vmem>>, vector<1x16x32xf32>
    %99 = vector.shape_cast %98 : vector<1x16x32xf32> to vector<16x32xf32>
    %100 = vector.shape_cast %97 : vector<16x32xf32> to vector<1x16x32xf32>
    tpu.vector_store %arg6[%c2, %c0_35, %c0_36], %100 {strides = array<i32>} : memref<8x16x64xf32, #tpu.memory_space<vmem>>, vector<1x16x32xf32>,
    %101 = vector.extract_strided_slice %96 {offsets = [0, 32], sizes = [16, 32], strides = [1, 1]} : vector<16x64xf32> to vector<16x32xf32>
    %c5 = arith.constant 5 : index
    %c0_37 = arith.constant 0 : index
    %c32_38 = arith.constant 32 : index
    %102 = vector.load %arg6[%c5, %c0_37, %c32_38] : memref<8x16x64xf32, #tpu.memory_space<vmem>>, vector<1x16x32xf32>
    %103 = vector.shape_cast %102 : vector<1x16x32xf32> to vector<16x32xf32>
    %104 = vector.shape_cast %101 : vector<16x32xf32> to vector<1x16x32xf32>
    tpu.vector_store %arg6[%c5, %c0_37, %c32_38], %104 {strides = array<i32>} : memref<8x16x64xf32, #tpu.memory_space<vmem>>, vector<1x16x32xf32>,
    %c48 = arith.constant 48 : index
    %c0_39 = arith.constant 0 : index
    %105 = vector.load %arg7[%c48, %c0_39] : memref<128x192xf32, #tpu.memory_space<vmem>>, vector<16x192xf32>
    %cst_40 = arith.constant dense<0.000000e+00> : vector<16x192xf32>
    %106 = tpu.matmul %96, %7, %cst_40 {dimension_numbers = #tpu.dot_dimension_numbers<[1], [0], [0], [1], [0, 0, 1, 1], [], []>} : vector<16x64xf32>, vector<64x192xf32>, vector<16x192xf32> -> vector<16x192xf32>
    %107 = vector.extract_strided_slice %105 {offsets = [0, 0], sizes = [16, 128], strides = [1, 1]} : vector<16x192xf32> to vector<16x128xf32>
    %108 = vector.extract_strided_slice %106 {offsets = [0, 0], sizes = [16, 128], strides = [1, 1]} : vector<16x192xf32> to vector<16x128xf32>
    %109 = arith.addf %107, %108 : vector<16x128xf32>
    %110 = arith.negf %109 : vector<16x128xf32>
    %111 = math.exp %110 : vector<16x128xf32>
    %cst_41 = arith.constant 1.000000e+00 : f32
    %112 = vector.broadcast %cst_41 : f32 to vector<16x128xf32>
    %113 = arith.addf %112, %111 : vector<16x128xf32>
    %114 = arith.divf %112, %113 : vector<16x128xf32>
    %115 = vector.extract_strided_slice %114 {offsets = [0, 0], sizes = [16, 64], strides = [1, 1]} : vector<16x128xf32> to vector<16x64xf32>
    %116 = vector.extract_strided_slice %114 {offsets = [0, 64], sizes = [16, 64], strides = [1, 1]} : vector<16x128xf32> to vector<16x64xf32>
    %117 = vector.extract_strided_slice %105 {offsets = [0, 128], sizes = [16, 64], strides = [1, 1]} : vector<16x192xf32> to vector<16x64xf32>
    %118 = vector.extract_strided_slice %106 {offsets = [0, 128], sizes = [16, 64], strides = [1, 1]} : vector<16x192xf32> to vector<16x64xf32>
    %119 = arith.addf %118, %10 : vector<16x64xf32>
    %120 = arith.mulf %115, %119 : vector<16x64xf32>
    %121 = arith.addf %117, %120 : vector<16x64xf32>
    %122 = math.tanh %121 : vector<16x64xf32>
    %cst_42 = arith.constant 1.000000e+00 : f32
    %123 = vector.broadcast %cst_42 : f32 to vector<16x64xf32>
    %124 = arith.subf %123, %116 : vector<16x64xf32>
    %125 = arith.mulf %124, %122 : vector<16x64xf32>
    %126 = arith.mulf %116, %96 : vector<16x64xf32>
    %127 = arith.addf %125, %126 : vector<16x64xf32>
    %128 = vector.extract_strided_slice %127 {offsets = [0, 0], sizes = [16, 32], strides = [1, 1]} : vector<16x64xf32> to vector<16x32xf32>
    %c3 = arith.constant 3 : index
    %c0_43 = arith.constant 0 : index
    %c0_44 = arith.constant 0 : index
    %129 = vector.load %arg6[%c3, %c0_43, %c0_44] : memref<8x16x64xf32, #tpu.memory_space<vmem>>, vector<1x16x32xf32>
    %130 = vector.shape_cast %129 : vector<1x16x32xf32> to vector<16x32xf32>
    %131 = vector.shape_cast %128 : vector<16x32xf32> to vector<1x16x32xf32>
    tpu.vector_store %arg6[%c3, %c0_43, %c0_44], %131 {strides = array<i32>} : memref<8x16x64xf32, #tpu.memory_space<vmem>>, vector<1x16x32xf32>,
    %132 = vector.extract_strided_slice %127 {offsets = [0, 32], sizes = [16, 32], strides = [1, 1]} : vector<16x64xf32> to vector<16x32xf32>
    %c4 = arith.constant 4 : index
    %c0_45 = arith.constant 0 : index
    %c32_46 = arith.constant 32 : index
    %133 = vector.load %arg6[%c4, %c0_45, %c32_46] : memref<8x16x64xf32, #tpu.memory_space<vmem>>, vector<1x16x32xf32>
    %134 = vector.shape_cast %133 : vector<1x16x32xf32> to vector<16x32xf32>
    %135 = vector.shape_cast %132 : vector<16x32xf32> to vector<1x16x32xf32>
    tpu.vector_store %arg6[%c4, %c0_45, %c32_46], %135 {strides = array<i32>} : memref<8x16x64xf32, #tpu.memory_space<vmem>>, vector<1x16x32xf32>,
    %c64 = arith.constant 64 : index
    %c0_47 = arith.constant 0 : index
    %136 = vector.load %arg7[%c64, %c0_47] : memref<128x192xf32, #tpu.memory_space<vmem>>, vector<16x192xf32>
    %cst_48 = arith.constant dense<0.000000e+00> : vector<16x192xf32>
    %137 = tpu.matmul %127, %7, %cst_48 {dimension_numbers = #tpu.dot_dimension_numbers<[1], [0], [0], [1], [0, 0, 1, 1], [], []>} : vector<16x64xf32>, vector<64x192xf32>, vector<16x192xf32> -> vector<16x192xf32>
    %138 = vector.extract_strided_slice %136 {offsets = [0, 0], sizes = [16, 128], strides = [1, 1]} : vector<16x192xf32> to vector<16x128xf32>
    %139 = vector.extract_strided_slice %137 {offsets = [0, 0], sizes = [16, 128], strides = [1, 1]} : vector<16x192xf32> to vector<16x128xf32>
    %140 = arith.addf %138, %139 : vector<16x128xf32>
    %141 = arith.negf %140 : vector<16x128xf32>
    %142 = math.exp %141 : vector<16x128xf32>
    %cst_49 = arith.constant 1.000000e+00 : f32
    %143 = vector.broadcast %cst_49 : f32 to vector<16x128xf32>
    %144 = arith.addf %143, %142 : vector<16x128xf32>
    %145 = arith.divf %143, %144 : vector<16x128xf32>
    %146 = vector.extract_strided_slice %145 {offsets = [0, 0], sizes = [16, 64], strides = [1, 1]} : vector<16x128xf32> to vector<16x64xf32>
    %147 = vector.extract_strided_slice %145 {offsets = [0, 64], sizes = [16, 64], strides = [1, 1]} : vector<16x128xf32> to vector<16x64xf32>
    %148 = vector.extract_strided_slice %136 {offsets = [0, 128], sizes = [16, 64], strides = [1, 1]} : vector<16x192xf32> to vector<16x64xf32>
    %149 = vector.extract_strided_slice %137 {offsets = [0, 128], sizes = [16, 64], strides = [1, 1]} : vector<16x192xf32> to vector<16x64xf32>
    %150 = arith.addf %149, %10 : vector<16x64xf32>
    %151 = arith.mulf %146, %150 : vector<16x64xf32>
    %152 = arith.addf %148, %151 : vector<16x64xf32>
    %153 = math.tanh %152 : vector<16x64xf32>
    %cst_50 = arith.constant 1.000000e+00 : f32
    %154 = vector.broadcast %cst_50 : f32 to vector<16x64xf32>
    %155 = arith.subf %154, %147 : vector<16x64xf32>
    %156 = arith.mulf %155, %153 : vector<16x64xf32>
    %157 = arith.mulf %147, %127 : vector<16x64xf32>
    %158 = arith.addf %156, %157 : vector<16x64xf32>
    %159 = vector.extract_strided_slice %158 {offsets = [0, 0], sizes = [16, 32], strides = [1, 1]} : vector<16x64xf32> to vector<16x32xf32>
    %c4_51 = arith.constant 4 : index
    %c0_52 = arith.constant 0 : index
    %c0_53 = arith.constant 0 : index
    %160 = vector.load %arg6[%c4_51, %c0_52, %c0_53] : memref<8x16x64xf32, #tpu.memory_space<vmem>>, vector<1x16x32xf32>
    %161 = vector.shape_cast %160 : vector<1x16x32xf32> to vector<16x32xf32>
    %162 = vector.shape_cast %159 : vector<16x32xf32> to vector<1x16x32xf32>
    tpu.vector_store %arg6[%c4_51, %c0_52, %c0_53], %162 {strides = array<i32>} : memref<8x16x64xf32, #tpu.memory_space<vmem>>, vector<1x16x32xf32>,
    %163 = vector.extract_strided_slice %158 {offsets = [0, 32], sizes = [16, 32], strides = [1, 1]} : vector<16x64xf32> to vector<16x32xf32>
    %c3_54 = arith.constant 3 : index
    %c0_55 = arith.constant 0 : index
    %c32_56 = arith.constant 32 : index
    %164 = vector.load %arg6[%c3_54, %c0_55, %c32_56] : memref<8x16x64xf32, #tpu.memory_space<vmem>>, vector<1x16x32xf32>
    %165 = vector.shape_cast %164 : vector<1x16x32xf32> to vector<16x32xf32>
    %166 = vector.shape_cast %163 : vector<16x32xf32> to vector<1x16x32xf32>
    tpu.vector_store %arg6[%c3_54, %c0_55, %c32_56], %166 {strides = array<i32>} : memref<8x16x64xf32, #tpu.memory_space<vmem>>, vector<1x16x32xf32>,
    %c80 = arith.constant 80 : index
    %c0_57 = arith.constant 0 : index
    %167 = vector.load %arg7[%c80, %c0_57] : memref<128x192xf32, #tpu.memory_space<vmem>>, vector<16x192xf32>
    %cst_58 = arith.constant dense<0.000000e+00> : vector<16x192xf32>
    %168 = tpu.matmul %158, %7, %cst_58 {dimension_numbers = #tpu.dot_dimension_numbers<[1], [0], [0], [1], [0, 0, 1, 1], [], []>} : vector<16x64xf32>, vector<64x192xf32>, vector<16x192xf32> -> vector<16x192xf32>
    %169 = vector.extract_strided_slice %167 {offsets = [0, 0], sizes = [16, 128], strides = [1, 1]} : vector<16x192xf32> to vector<16x128xf32>
    %170 = vector.extract_strided_slice %168 {offsets = [0, 0], sizes = [16, 128], strides = [1, 1]} : vector<16x192xf32> to vector<16x128xf32>
    %171 = arith.addf %169, %170 : vector<16x128xf32>
    %172 = arith.negf %171 : vector<16x128xf32>
    %173 = math.exp %172 : vector<16x128xf32>
    %cst_59 = arith.constant 1.000000e+00 : f32
    %174 = vector.broadcast %cst_59 : f32 to vector<16x128xf32>
    %175 = arith.addf %174, %173 : vector<16x128xf32>
    %176 = arith.divf %174, %175 : vector<16x128xf32>
    %177 = vector.extract_strided_slice %176 {offsets = [0, 0], sizes = [16, 64], strides = [1, 1]} : vector<16x128xf32> to vector<16x64xf32>
    %178 = vector.extract_strided_slice %176 {offsets = [0, 64], sizes = [16, 64], strides = [1, 1]} : vector<16x128xf32> to vector<16x64xf32>
    %179 = vector.extract_strided_slice %167 {offsets = [0, 128], sizes = [16, 64], strides = [1, 1]} : vector<16x192xf32> to vector<16x64xf32>
    %180 = vector.extract_strided_slice %168 {offsets = [0, 128], sizes = [16, 64], strides = [1, 1]} : vector<16x192xf32> to vector<16x64xf32>
    %181 = arith.addf %180, %10 : vector<16x64xf32>
    %182 = arith.mulf %177, %181 : vector<16x64xf32>
    %183 = arith.addf %179, %182 : vector<16x64xf32>
    %184 = math.tanh %183 : vector<16x64xf32>
    %cst_60 = arith.constant 1.000000e+00 : f32
    %185 = vector.broadcast %cst_60 : f32 to vector<16x64xf32>
    %186 = arith.subf %185, %178 : vector<16x64xf32>
    %187 = arith.mulf %186, %184 : vector<16x64xf32>
    %188 = arith.mulf %178, %158 : vector<16x64xf32>
    %189 = arith.addf %187, %188 : vector<16x64xf32>
    %190 = vector.extract_strided_slice %189 {offsets = [0, 0], sizes = [16, 32], strides = [1, 1]} : vector<16x64xf32> to vector<16x32xf32>
    %c5_61 = arith.constant 5 : index
    %c0_62 = arith.constant 0 : index
    %c0_63 = arith.constant 0 : index
    %191 = vector.load %arg6[%c5_61, %c0_62, %c0_63] : memref<8x16x64xf32, #tpu.memory_space<vmem>>, vector<1x16x32xf32>
    %192 = vector.shape_cast %191 : vector<1x16x32xf32> to vector<16x32xf32>
    %193 = vector.shape_cast %190 : vector<16x32xf32> to vector<1x16x32xf32>
    tpu.vector_store %arg6[%c5_61, %c0_62, %c0_63], %193 {strides = array<i32>} : memref<8x16x64xf32, #tpu.memory_space<vmem>>, vector<1x16x32xf32>,
    %194 = vector.extract_strided_slice %189 {offsets = [0, 32], sizes = [16, 32], strides = [1, 1]} : vector<16x64xf32> to vector<16x32xf32>
    %c2_64 = arith.constant 2 : index
    %c0_65 = arith.constant 0 : index
    %c32_66 = arith.constant 32 : index
    %195 = vector.load %arg6[%c2_64, %c0_65, %c32_66] : memref<8x16x64xf32, #tpu.memory_space<vmem>>, vector<1x16x32xf32>
    %196 = vector.shape_cast %195 : vector<1x16x32xf32> to vector<16x32xf32>
    %197 = vector.shape_cast %194 : vector<16x32xf32> to vector<1x16x32xf32>
    tpu.vector_store %arg6[%c2_64, %c0_65, %c32_66], %197 {strides = array<i32>} : memref<8x16x64xf32, #tpu.memory_space<vmem>>, vector<1x16x32xf32>,
    %c96 = arith.constant 96 : index
    %c0_67 = arith.constant 0 : index
    %198 = vector.load %arg7[%c96, %c0_67] : memref<128x192xf32, #tpu.memory_space<vmem>>, vector<16x192xf32>
    %cst_68 = arith.constant dense<0.000000e+00> : vector<16x192xf32>
    %199 = tpu.matmul %189, %7, %cst_68 {dimension_numbers = #tpu.dot_dimension_numbers<[1], [0], [0], [1], [0, 0, 1, 1], [], []>} : vector<16x64xf32>, vector<64x192xf32>, vector<16x192xf32> -> vector<16x192xf32>
    %200 = vector.extract_strided_slice %198 {offsets = [0, 0], sizes = [16, 128], strides = [1, 1]} : vector<16x192xf32> to vector<16x128xf32>
    %201 = vector.extract_strided_slice %199 {offsets = [0, 0], sizes = [16, 128], strides = [1, 1]} : vector<16x192xf32> to vector<16x128xf32>
    %202 = arith.addf %200, %201 : vector<16x128xf32>
    %203 = arith.negf %202 : vector<16x128xf32>
    %204 = math.exp %203 : vector<16x128xf32>
    %cst_69 = arith.constant 1.000000e+00 : f32
    %205 = vector.broadcast %cst_69 : f32 to vector<16x128xf32>
    %206 = arith.addf %205, %204 : vector<16x128xf32>
    %207 = arith.divf %205, %206 : vector<16x128xf32>
    %208 = vector.extract_strided_slice %207 {offsets = [0, 0], sizes = [16, 64], strides = [1, 1]} : vector<16x128xf32> to vector<16x64xf32>
    %209 = vector.extract_strided_slice %207 {offsets = [0, 64], sizes = [16, 64], strides = [1, 1]} : vector<16x128xf32> to vector<16x64xf32>
    %210 = vector.extract_strided_slice %198 {offsets = [0, 128], sizes = [16, 64], strides = [1, 1]} : vector<16x192xf32> to vector<16x64xf32>
    %211 = vector.extract_strided_slice %199 {offsets = [0, 128], sizes = [16, 64], strides = [1, 1]} : vector<16x192xf32> to vector<16x64xf32>
    %212 = arith.addf %211, %10 : vector<16x64xf32>
    %213 = arith.mulf %208, %212 : vector<16x64xf32>
    %214 = arith.addf %210, %213 : vector<16x64xf32>
    %215 = math.tanh %214 : vector<16x64xf32>
    %cst_70 = arith.constant 1.000000e+00 : f32
    %216 = vector.broadcast %cst_70 : f32 to vector<16x64xf32>
    %217 = arith.subf %216, %209 : vector<16x64xf32>
    %218 = arith.mulf %217, %215 : vector<16x64xf32>
    %219 = arith.mulf %209, %189 : vector<16x64xf32>
    %220 = arith.addf %218, %219 : vector<16x64xf32>
    %221 = vector.extract_strided_slice %220 {offsets = [0, 0], sizes = [16, 32], strides = [1, 1]} : vector<16x64xf32> to vector<16x32xf32>
    %c6_71 = arith.constant 6 : index
    %c0_72 = arith.constant 0 : index
    %c0_73 = arith.constant 0 : index
    %222 = vector.load %arg6[%c6_71, %c0_72, %c0_73] : memref<8x16x64xf32, #tpu.memory_space<vmem>>, vector<1x16x32xf32>
    %223 = vector.shape_cast %222 : vector<1x16x32xf32> to vector<16x32xf32>
    %224 = vector.shape_cast %221 : vector<16x32xf32> to vector<1x16x32xf32>
    tpu.vector_store %arg6[%c6_71, %c0_72, %c0_73], %224 {strides = array<i32>} : memref<8x16x64xf32, #tpu.memory_space<vmem>>, vector<1x16x32xf32>,
    %225 = vector.extract_strided_slice %220 {offsets = [0, 32], sizes = [16, 32], strides = [1, 1]} : vector<16x64xf32> to vector<16x32xf32>
    %c1_74 = arith.constant 1 : index
    %c0_75 = arith.constant 0 : index
    %c32_76 = arith.constant 32 : index
    %226 = vector.load %arg6[%c1_74, %c0_75, %c32_76] : memref<8x16x64xf32, #tpu.memory_space<vmem>>, vector<1x16x32xf32>
    %227 = vector.shape_cast %226 : vector<1x16x32xf32> to vector<16x32xf32>
    %228 = vector.shape_cast %225 : vector<16x32xf32> to vector<1x16x32xf32>
    tpu.vector_store %arg6[%c1_74, %c0_75, %c32_76], %228 {strides = array<i32>} : memref<8x16x64xf32, #tpu.memory_space<vmem>>, vector<1x16x32xf32>,
    %c112 = arith.constant 112 : index
    %c0_77 = arith.constant 0 : index
    %229 = vector.load %arg7[%c112, %c0_77] : memref<128x192xf32, #tpu.memory_space<vmem>>, vector<16x192xf32>
    %cst_78 = arith.constant dense<0.000000e+00> : vector<16x192xf32>
    %230 = tpu.matmul %220, %7, %cst_78 {dimension_numbers = #tpu.dot_dimension_numbers<[1], [0], [0], [1], [0, 0, 1, 1], [], []>} : vector<16x64xf32>, vector<64x192xf32>, vector<16x192xf32> -> vector<16x192xf32>
    %231 = vector.extract_strided_slice %229 {offsets = [0, 0], sizes = [16, 128], strides = [1, 1]} : vector<16x192xf32> to vector<16x128xf32>
    %232 = vector.extract_strided_slice %230 {offsets = [0, 0], sizes = [16, 128], strides = [1, 1]} : vector<16x192xf32> to vector<16x128xf32>
    %233 = arith.addf %231, %232 : vector<16x128xf32>
    %234 = arith.negf %233 : vector<16x128xf32>
    %235 = math.exp %234 : vector<16x128xf32>
    %cst_79 = arith.constant 1.000000e+00 : f32
    %236 = vector.broadcast %cst_79 : f32 to vector<16x128xf32>
    %237 = arith.addf %236, %235 : vector<16x128xf32>
    %238 = arith.divf %236, %237 : vector<16x128xf32>
    %239 = vector.extract_strided_slice %238 {offsets = [0, 0], sizes = [16, 64], strides = [1, 1]} : vector<16x128xf32> to vector<16x64xf32>
    %240 = vector.extract_strided_slice %238 {offsets = [0, 64], sizes = [16, 64], strides = [1, 1]} : vector<16x128xf32> to vector<16x64xf32>
    %241 = vector.extract_strided_slice %229 {offsets = [0, 128], sizes = [16, 64], strides = [1, 1]} : vector<16x192xf32> to vector<16x64xf32>
    %242 = vector.extract_strided_slice %230 {offsets = [0, 128], sizes = [16, 64], strides = [1, 1]} : vector<16x192xf32> to vector<16x64xf32>
    %243 = arith.addf %242, %10 : vector<16x64xf32>
    %244 = arith.mulf %239, %243 : vector<16x64xf32>
    %245 = arith.addf %241, %244 : vector<16x64xf32>
    %246 = math.tanh %245 : vector<16x64xf32>
    %cst_80 = arith.constant 1.000000e+00 : f32
    %247 = vector.broadcast %cst_80 : f32 to vector<16x64xf32>
    %248 = arith.subf %247, %240 : vector<16x64xf32>
    %249 = arith.mulf %248, %246 : vector<16x64xf32>
    %250 = arith.mulf %240, %220 : vector<16x64xf32>
    %251 = arith.addf %249, %250 : vector<16x64xf32>
    %252 = vector.extract_strided_slice %251 {offsets = [0, 0], sizes = [16, 32], strides = [1, 1]} : vector<16x64xf32> to vector<16x32xf32>
    %c7_81 = arith.constant 7 : index
    %c0_82 = arith.constant 0 : index
    %c0_83 = arith.constant 0 : index
    %253 = vector.load %arg6[%c7_81, %c0_82, %c0_83] : memref<8x16x64xf32, #tpu.memory_space<vmem>>, vector<1x16x32xf32>
    %254 = vector.shape_cast %253 : vector<1x16x32xf32> to vector<16x32xf32>
    %255 = vector.shape_cast %252 : vector<16x32xf32> to vector<1x16x32xf32>
    tpu.vector_store %arg6[%c7_81, %c0_82, %c0_83], %255 {strides = array<i32>} : memref<8x16x64xf32, #tpu.memory_space<vmem>>, vector<1x16x32xf32>,
    %256 = vector.extract_strided_slice %251 {offsets = [0, 32], sizes = [16, 32], strides = [1, 1]} : vector<16x64xf32> to vector<16x32xf32>
    %c0_84 = arith.constant 0 : index
    %c0_85 = arith.constant 0 : index
    %c32_86 = arith.constant 32 : index
    %257 = vector.load %arg6[%c0_84, %c0_85, %c32_86] : memref<8x16x64xf32, #tpu.memory_space<vmem>>, vector<1x16x32xf32>
    %258 = vector.shape_cast %257 : vector<1x16x32xf32> to vector<16x32xf32>
    %259 = vector.shape_cast %256 : vector<16x32xf32> to vector<1x16x32xf32>
    tpu.vector_store %arg6[%c0_84, %c0_85, %c32_86], %259 {strides = array<i32>} : memref<8x16x64xf32, #tpu.memory_space<vmem>>, vector<1x16x32xf32>,
    return
  }
}

</mosaic_0001>

<bundles_post_ra>
// kernel: tpu_custom_call.1
= control target key start
LH: loop header
LB: loop body
LE: loop exit
PB: predicated region body
PF: predicated region fallthrough
CT: control target
= control target key end

     0   :  { %11 = vsyncpa [#allocation4], 0  ;;  %s2300_s0 = inlined_call_operand.vmem [shape: f32[128,16], index: 0, kind: input, shape index: {}]   ;;  %s2301_s1 = inlined_call_operand.hbm [shape: f32[16,192], index: 1, kind: input, shape index: {}]   ;;  %s2302_s2 = inlined_call_operand.vmem [shape: f32[64,192], index: 2, kind: input, shape index: {}]   ;;  %s2303_s3 = inlined_call_operand.vmem [shape: f32[1,192], index: 3, kind: input, shape index: {}]   ;;  %s2304_s4 = inlined_call_operand.vmem [shape: f32[1,64], index: 4, kind: input, shape index: {}]   ;;  %s2305_s5 = inlined_call_operand.vmem [shape: f32[16,64], index: 5, kind: input, shape index: {}]   ;;  %s2306_s6 = inlined_call_operand.hbm [shape: f32[8,16,64], index: 6, kind: output, shape index: {}]  }
   0x1   :  { %12 = vsyncpa [#allocation5], 0  ;;  %s1786_s21 = smov [#allocation3]   ;;  %s1738_s25 = scalar_lea.hbm %s2301_s1, 512 }
   0x2   :  { %s20_s22 = sshll.u32 %s1786_s21, 4  ;;  %p1739_p0 = scmp.ne.s32.totalorder %s2301_s1, %s1738_s25  ;;  %s21_s22 = int_to_ptr.vmem [resolvable:$true] %s20_s22 }
   0x3   :  { %p1742_p1 = scmp.lt.u32.totalorder %s1738_s25, %s2301_s1 }
   0x5   :  { %p1744_p2 = pnand %p1742_p1, %p1739_p0 }
   0x7   :  { %1747 = shalt.err (!%p1744_p2)
}
   0x8   :  { %s1748_s30 = scalar_lea.vmem %s21_s22, 512  ;;  %p1753_p4 = scmp.lt.s32.totalorder %s21_s22, %s21_s22 }
   0x9   :  { %p1749_p3 = scmp.ne.s32.totalorder %s21_s22, %s1748_s30  ;;  %p1754_p5 = scmp.lt.s32.totalorder %s1748_s30, %s1748_s30 }
   0xb   :  { %p1755_p6 = por %p1754_p5, %p1753_p4 }
   0xd   :  { %p1756_p7 = pnand %p1755_p6, %p1749_p3 }
   0xf   :  { %1759 = shalt.err (!%p1756_p7)
}
  0x10   :  { %s1787_s7 = smov 256   ;;  %s1788_s8 = smov 16  }
  0x11   :  { %26 = dma.hbm_to_vmem [thread:$0]  %s2301_s1, 512, %s21_s22, [#allocation4], %s1787_s7, %s1787_s7, %s1788_s8  }
  0x12   :  { %1782 = dma.done.wait [#allocation4], 512  }
  0x13   :  { %1783 = vsyncadd [#allocation4], 4294966784  ;;  %v1789_v0 = vmov 0.0   ;;  %v314_v1 = vld [vmem:[%s2302_s2 + $0x8] sm:$0xff]  ;;  %v316_v2 = vld [vmem:[%s2302_s2 + $0x18] sm:$0xff]  ;;  %vm70_vm0 = vcmask 130048   ;;  %v60_v35 = vlaneseq }
  0x14   :  { %183 = vmatprep.mubr.f32.mxu0 %v1789_v0  ;;  %412 = vmatprep.mubr.f32.mxu1 %v1789_v0  ;;  %v55_v3 = vld [vmem:[#allocation3 + $0x8] sm:$0xff]  ;;  %v1849_v4 = vpack.c.bf16 %v316_v2, %v314_v1  ;;  %v57_v5 = vld [vmem:[#allocation3 + $0x18] sm:$0xff]  ;;  %v313_v6 = vld [vmem:[%s2302_s2] sm:$0xff]  ;;  %vm281_vm1 = vcmask 523264   ;;  %s1790_s28 = smov 64   ;;  %vm477_vm2 = vcmask 261120  }
  0x15   :  { %v315_v7 = vld [vmem:[%s2302_s2 + $0x10] sm:$0xff]  ;;  %v1501_v8 = vpack.c.bf16 %v57_v5, %v55_v3  ;;  %v54_v10 = vld [vmem:[#allocation3] sm:$0xff]  ;;  %v318_v12 = vld [vmem:[%s2302_s2 + $0x28] sm:$0xff]  ;;  %v61_v36 = vshrl.u32 %v60_v35, 7  ;;  %vm481_vm3 = vcmask 523520  }
  0x16   :  { %v1857_v9 = vpack.c.bf16 %v315_v7, %v313_v6  ;;  %v56_v11 = vld [vmem:[#allocation3 + $0x10] sm:$0xff]  ;;  %1506 = vmatprep.subr.bf16.mxu1 %v1849_v4  ;;  %v320_v14 = vld [vmem:[%s2302_s2 + $0x38] sm:$0xff]  ;;  %v317_v15 = vld [vmem:[%s2302_s2 + $0x20] sm:$0xff] }
  0x17   :  { %v1503_v13 = vpack.c.bf16 %v56_v11, %v54_v10  ;;  %1502 = vmatprep.subr.bf16.mxu0 %v1501_v8  ;;  %v1870_v16 = vpack.c.bf16 %v320_v14, %v318_v12  ;;  %v319_v17 = vld [vmem:[%s2302_s2 + $0x30] sm:$0xff]  ;;  %v322_v18 = vld [vmem:[%s2302_s2 + $0x48] sm:$0xff]  ;;  %v324_v19 = vld [vmem:[%s2302_s2 + $0x58] sm:$0xff]  ;;  %v62_v37 = vsub.s32 0, %v61_v36  ;;  %v66_v39 = vsub.s32 1, %v61_v36 }
  0x18   :  { %1508 = vmatpush1.bf16.msra.mxu1 %v1857_v9  ;;  %v38_v20 = vld [vmem:[%s2300_s0] sm:$0xff]  ;;  %v1884_v21 = vpack.c.bf16 %v319_v17, %v317_v15  ;;  %v1886_v22 = vpack.c.bf16 %v324_v19, %v322_v18  ;;  %v323_v24 = vld [vmem:[%s2302_s2 + $0x50] sm:$0xff]  ;;  %v326_v25 = vld [vmem:[%s2302_s2 + $0x68] sm:$0xff] }
  0x19   :  { %1504 = vmatpush1.bf16.msra.mxu0 %v1503_v13  ;;  %v321_v23 = vld [vmem:[%s2302_s2 + $0x40] sm:$0xff]  ;;  %1510 = vmatprep.subr.bf16.mxu1 %v1870_v16  ;;  %v328_v26 = vld [vmem:[%s2302_s2 + $0x78] sm:$0xff]  ;;  %v39_v28 = vld [vmem:[%s2300_s0 + $0x8] sm:$0xff] }
  0x1a   :  { %1570 = vmatprep.subr.bf16.mxu0 %v1849_v4  ;;  %v1904_v27 = vpack.c.bf16 %v323_v24, %v321_v23  ;;  %v1911_v29 = vpack.c.bf16 %v328_v26, %v326_v25  ;;  %v325_v30 = vld [vmem:[%s2302_s2 + $0x60] sm:$0xff]  ;;  %v327_v31 = vld [vmem:[%s2302_s2 + $0x70] sm:$0xff]  ;;  %v1944_v34 = vld [vmem:[%s2305_s5 + $0x8] sm:$0xff] }
  0x1b   :  { %v1923_v32 = vpack.c.bf16 %v327_v31, %v325_v30  ;;  %v1933_v33 = vld [vmem:[%s2305_s5] sm:$0xff]  ;;  %v40_v13 = vld [vmem:[%s2300_s0 + $0x10] sm:$0xff]  ;;  %v41_v14 = vld [vmem:[%s2300_s0 + $0x18] sm:$0xff] }
  0x1c   :  { %1452 = vmatmul.mubr.msk.f32.vlgmr.msra.gmra.mrb[0].mxu0 %vm70_vm0, %v38_v20  ;;  %1512 = vmatpush1.bf16.msra.mxu1 %v1884_v21  ;;  %v58_v38 = vld [vmem:[%s2303_s3] sm:$0x3] }
  0x1d   :  { %189 = vmatprep.mubr.f32.mxu0 %v1789_v0  ;;  %1514 = vmatprep.subr.bf16.mxu1 %v1886_v22  ;;  %v1962_v40 = vrot.slane %v58_v38, %v62_v37  ;;  %v1964_v41 = vrot.slane %v58_v38, %v66_v39  ;;  %v1975_v62 = vld [vmem:[%s2304_s4] ss:$0 sm:$0xff] }
  0x1e   :  { %1572 = vmatpush1.bf16.msra.mxu0 %v1857_v9 }
  0x1f   :  { %1574 = vmatprep.subr.bf16.mxu0 %v1870_v16 }
  0x20   :  { %1453 = vmatmul.mubr.msk.f32.gmra.mrb[2].mxu0 %vm70_vm0, %v39_v28  ;;  %1516 = vmatpush1.bf16.msra.mxu1 %v1904_v27 }
  0x21   :  { %1518 = vmatprep.subr.bf16.mxu1 %v1911_v29  ;;  %195 = vmatprep.mubr.f32.mxu0 %v1789_v0 }
  0x22   :  { %1576 = vmatpush1.bf16.msra.mxu0 %v1884_v21 }
  0x23   :  { %1578 = vmatprep.subr.bf16.mxu0 %v1886_v22 }
  0x24   :  { %1520 = vmatpush1.bf16.msra.mxu1 %v1923_v32  ;;  %1454 = vmatmul.mubr.msk.f32.gmra.mrb[4].mxu0 %vm70_vm0, %v40_v13 }
  0x25   :  { %1522 = vmatprep.subr.bf16.mxu1 %v1849_v4  ;;  %201 = vmatprep.mubr.f32.mxu0 %v1789_v0 }
  0x26   :  { %1580 = vmatpush1.bf16.msra.mxu0 %v1904_v27 }
  0x27   :  { %1469 = vmatmul.mubr.msk.f32.vlgmr.msra.gmra.mrb[0].mxu1 %vm281_vm1, %v1933_v33  ;;  %1582 = vmatprep.subr.bf16.mxu0 %v1911_v29 }
  0x28   :  { %418 = vmatprep.mubr.f32.mxu1 %v1789_v0  ;;  %1524 = vmatpush1.bf16.msra.mxu1 %v1857_v9 }
  0x29   :  { %1526 = vmatprep.subr.bf16.mxu1 %v1870_v16  ;;  %1455 = vmatmul.mubr.msk.f32.gmra.mrb[6].mxu0 %vm70_vm0, %v41_v14 }
  0x2a   :  { %1584 = vmatpush1.bf16.msra.mxu0 %v1923_v32  ;;  %207 = vmatprep.mubr.f32.mxu0 %v1789_v0 }
  0x2b   :  { %1470 = vmatmul.mubr.msk.f32.gmra.mrb[2].mxu1 %vm281_vm1, %v1944_v34  ;;  %1602 = vmatprep.subr.bf16.mxu0 %v1849_v4 }
  0x2c   :  { %1528 = vmatpush1.bf16.msra.mxu1 %v1884_v21  ;;  %556 = vmatprep.mubr.f32.mxu1 %v1789_v0 }
  0x2d   :  { %1530 = vmatprep.subr.bf16.mxu1 %v1886_v22 }
  0x30   :  { %1532 = vmatpush1.bf16.msra.mxu1 %v1904_v27 }
  0x31   :  { %1534 = vmatprep.subr.bf16.mxu1 %v1911_v29 }
  0x34   :  { %1536 = vmatpush1.bf16.msra.mxu1 %v1923_v32 }
  0x35   :  { %1538 = vmatprep.subr.bf16.mxu1 %v1849_v4 }
  0xef   :  { %v185_v42 = vpop.f32.mrb[0].mxu0 }
  0xf0   :  { %v186_v43 = vadd.f32 %v185_v42, %v1962_v40  ;;  %v187_v44 = vpop.f32.mrb[1].mxu0 }
  0xf1   :  { %v188_v45 = vadd.f32 %v187_v44, %v1964_v41 }
  0xf3   :  { %282 = vst.msk [vmem:[#allocation2 + $0x8] sm:$0xff] %vm281_vm1, %v188_v45  ;;  %v191_v46 = vpop.f32.mrb[2].mxu0 }
  0xf4   :  { %v192_v47 = vadd.f32 %v191_v46, %v1962_v40  ;;  %v193_v48 = vpop.f32.mrb[3].mxu0 }
  0xf5   :  { %v194_v49 = vadd.f32 %v193_v48, %v1964_v41 }
  0xf7   :  { %284 = vst.msk [vmem:[#allocation2 + $0x18] sm:$0xff] %vm281_vm1, %v194_v49 }
  0xfa   :  { %v414_v50 = vpop.f32.mrb[0].mxu1  ;;  %v339_v3 = vld [vmem:[#allocation2 + $0x8] sm:$0xff] }
  0xfb   :  { %v425_v51 = vadd.f32 %v414_v50, %v186_v43  ;;  %v416_v52 = vpop.f32.mrb[1].mxu1 }
  0xfc   :  { %v439_v63 = vadd.f32 %v1975_v62, %v416_v52 }
  0xfd   :  { %v1471_v53 = vmul.f32 -1.442695, %v425_v51 }
  0xfe   :  { %v420_v54 = vpop.f32.mrb[2].mxu1  ;;  %v341_v10 = vld [vmem:[#allocation2 + $0x18] sm:$0xff] }
  0xff   :  { %1641 = vpow2.f32 %v1471_v53  ;;  %v426_v55 = vadd.f32 %v420_v54, %v192_v47  ;;  %v422_v56 = vpop.f32.mrb[3].mxu1 }
 0x100   :  { %v440_v6 = vadd.f32 %v1975_v62, %v422_v56 }
 0x101   :  { %v1472_v57 = vmul.f32 -1.442695, %v426_v55 }
 0x103   :  { %1643 = vpow2.f32 %v1472_v57 }
 0x109   :  { %v1642_v58 = vpop.eup %1641 }
 0x10a   :  { %v433_v59 = vadd.f32 1.0, %v1642_v58 }
 0x10c   :  { %1645 = vrcp.f32 %v433_v59 }
 0x10d   :  { %v1644_v60 = vpop.eup %1643 }
 0x10e   :  { %v434_v61 = vadd.f32 1.0, %v1644_v60 }
 0x110   :  { %1647 = vrcp.f32 %v434_v61 }
 0x116   :  { %v1646_v1 = vpop.eup %1645 }
 0x117   :  { %v441_v2 = vmul.f32 %v1646_v1, %v439_v63  ;;  %v447_v18 = vsub.f32 1.0, %v1646_v1 }
 0x119   :  { %v443_v5 = vadd.f32 %v441_v2, %v339_v3 }
 0x11a   :  { %v1648_v7 = vpop.eup %1647 }
 0x11b   :  { %1649 = vtanh.f32 %v443_v5  ;;  %v442_v8 = vmul.f32 %v1648_v7, %v440_v6  ;;  %v448_v25 = vsub.f32 1.0, %v1648_v7 }
 0x11d   :  { %v444_v11 = vadd.f32 %v442_v8, %v341_v10  ;;  %v43_v8 = vld [vmem:[%s2300_s0 + $0x28] sm:$0xff] }
 0x11f   :  { %1651 = vtanh.f32 %v444_v11 }
 0x125   :  { %v1650_v12 = vpop.eup %1649 }
 0x126   :  { %451 = vrot.lane.b32.xlu0 %v1650_v12, %s1790_s28 }
 0x129   :  { %v1652_v15 = vpop.eup %1651 }
 0x12a   :  { %453 = vrot.lane.b32.xlu1 %v1652_v15, %s1790_s28  ;;  %459 = vrot.lane.b32.xlu0 %v1933_v33, %s1790_s28 }
 0x12e   :  { %461 = vrot.lane.b32.xlu1 %v1944_v34, %s1790_s28  ;;  %v197_v34 = vpop.f32.mrb[4].mxu0 }
 0x12f   :  { %v198_v35 = vadd.f32 %v197_v34, %v1962_v40  ;;  %v199_v36 = vpop.f32.mrb[5].mxu0 }
 0x130   :  { %v200_v37 = vadd.f32 %v199_v36, %v1964_v41  ;;  %v203_v38 = vpop.f32.mrb[6].mxu0 }
 0x131   :  { %v204_v39 = vadd.f32 %v203_v38, %v1962_v40  ;;  %v205_v42 = vpop.f32.mrb[7].mxu0 }
 0x132   :  { %286 = vst.msk [vmem:[#allocation2 + $0x28] sm:$0xff] %vm281_vm1, %v200_v37  ;;  %v206_v43 = vadd.f32 %v205_v42, %v1964_v41 }
 0x134   :  { %288 = vst.msk [vmem:[#allocation2 + $0x38] sm:$0xff] %vm281_vm1, %v206_v43 }
 0x139   :  { %v485_v61 = vld [vmem:[#allocation2 + $0x28] sm:$0xff] }
 0x13b   :  { %v487_v5 = vld [vmem:[#allocation2 + $0x38] sm:$0xff] }
 0x198   :  { %v452_v17 = vpop.permute.xlu0 %451 }
 0x199   :  { %v457_v23 = vmul.f32 %v452_v17, %v447_v18 }
 0x19c   :  { %v454_v19 = vpop.permute.xlu1 %453  ;;  %v460_v20 = vpop.permute.xlu0 %459 }
 0x19d   :  { %v465_v24 = vmul.f32 %v1646_v1, %v460_v20  ;;  %v458_v30 = vmul.f32 %v454_v19, %v448_v25 }
 0x19f   :  { %v1995_v26 = vadd.f32 %v465_v24, %v457_v23 }
 0x1a0   :  { %v462_v28 = vpop.permute.xlu1 %461 }
 0x1a1   :  { %v466_v31 = vmul.f32 %v1648_v7, %v462_v28  ;;  %471 = vrot.lane.b32.xlu0 %v1995_v26, %s1790_s28  ;;  %v42_v7 = vld [vmem:[%s2300_s0 + $0x20] sm:$0xff] }
 0x1a2   :  { %1456 = vmatmul.mubr.msk.f32.gmra.mrb[8].mxu0 %vm70_vm0, %v42_v7 }
 0x1a3   :  { %v1999_v33 = vadd.f32 %v466_v31, %v458_v30  ;;  %213 = vmatprep.mubr.f32.mxu0 %v1789_v0 }
 0x1a5   :  { %473 = vrot.lane.b32.xlu1 %v1999_v33, %s1790_s28 }
 0x1a6   :  { %1457 = vmatmul.mubr.msk.f32.gmra.mrb[10].mxu0 %vm70_vm0, %v43_v8 }
 0x1a7   :  { %219 = vmatprep.mubr.f32.mxu0 %v1789_v0 }
 0x213   :  { %v472_v44 = vpop.permute.xlu0 %471 }
 0x214   :  { %478 = vst.msk [vmem:[#allocation6] sm:$0xff] %vm477_vm2, %v472_v44  ;;  %1473 = vmatmul.mubr.msk.f32.vlgmr.msra.gmra.mrb[4].mxu1 %vm281_vm1, %v472_v44 }
 0x215   :  { %482 = vst.msk [vmem:[#allocation6 + $0x70] sm:$0xff] %vm481_vm3, %v472_v44  ;;  %562 = vmatprep.mubr.f32.mxu1 %v1789_v0  ;;  %1540 = vmatpush1.bf16.msra.mxu1 %v1857_v9 }
 0x216   :  { %1542 = vmatprep.subr.bf16.mxu1 %v1870_v16 }
 0x217   :  { %v474_v45 = vpop.permute.xlu1 %473 }
 0x218   :  { %479 = vst.msk [vmem:[#allocation6 + $0x8] sm:$0xff] %vm477_vm2, %v474_v45  ;;  %1474 = vmatmul.mubr.msk.f32.gmra.mrb[6].mxu1 %vm281_vm1, %v474_v45 }
 0x219   :  { %483 = vst.msk [vmem:[#allocation6 + $0x78] sm:$0xff] %vm481_vm3, %v474_v45  ;;  %1544 = vmatpush1.bf16.msra.mxu1 %v1884_v21  ;;  %693 = vmatprep.mubr.f32.mxu1 %v1789_v0 }
 0x21a   :  { %1546 = vmatprep.subr.bf16.mxu1 %v1886_v22 }
 0x21d   :  { %1548 = vmatpush1.bf16.msra.mxu1 %v1904_v27 }
 0x21e   :  { %1550 = vmatprep.subr.bf16.mxu1 %v1911_v29 }
 0x221   :  { %1552 = vmatpush1.bf16.msra.mxu1 %v1923_v32 }
 0x222   :  { %1554 = vmatprep.subr.bf16.mxu1 %v1849_v4 }
 0x275   :  { %v209_v25 = vpop.f32.mrb[8].mxu0 }
 0x276   :  { %v210_v28 = vadd.f32 %v209_v25, %v1962_v40 }
 0x2e7   :  { %v558_v46 = vpop.f32.mrb[4].mxu1 }
 0x2e8   :  { %v569_v47 = vadd.f32 %v558_v46, %v198_v35  ;;  %v560_v48 = vpop.f32.mrb[5].mxu1 }
 0x2e9   :  { %v583_v58 = vadd.f32 %v1975_v62, %v560_v48 }
 0x2ea   :  { %v1475_v49 = vmul.f32 -1.442695, %v569_v47 }
 0x2eb   :  { %v564_v50 = vpop.f32.mrb[6].mxu1 }
 0x2ec   :  { %1653 = vpow2.f32 %v1475_v49  ;;  %v570_v51 = vadd.f32 %v564_v50, %v204_v39  ;;  %v566_v52 = vpop.f32.mrb[7].mxu1 }
 0x2ed   :  { %v584_v1 = vadd.f32 %v1975_v62, %v566_v52 }
 0x2ee   :  { %v1476_v53 = vmul.f32 -1.442695, %v570_v51 }
 0x2f0   :  { %1655 = vpow2.f32 %v1476_v53 }
 0x2f6   :  { %v1654_v54 = vpop.eup %1653 }
 0x2f7   :  { %v577_v55 = vadd.f32 1.0, %v1654_v54 }
 0x2f9   :  { %1657 = vrcp.f32 %v577_v55 }
 0x2fa   :  { %v1656_v56 = vpop.eup %1655 }
 0x2fb   :  { %v578_v57 = vadd.f32 1.0, %v1656_v56 }
 0x2fd   :  { %1659 = vrcp.f32 %v578_v57 }
 0x303   :  { %v1658_v59 = vpop.eup %1657 }
 0x304   :  { %v585_v60 = vmul.f32 %v1658_v59, %v583_v58  ;;  %v591_v12 = vsub.f32 1.0, %v1658_v59  ;;  %v603_v14 = vmul.f32 %v1658_v59, %v1995_v26  ;;  %v211_v26 = vpop.f32.mrb[9].mxu0 }
 0x305   :  { %v212_v30 = vadd.f32 %v211_v26, %v1964_v41  ;;  %v215_v31 = vpop.f32.mrb[10].mxu0 }
 0x306   :  { %v587_v63 = vadd.f32 %v585_v60, %v485_v61  ;;  %v217_v34 = vpop.f32.mrb[11].mxu0 }
 0x307   :  { %v1660_v2 = vpop.eup %1659  ;;  %290 = vst.msk [vmem:[#allocation2 + $0x48] sm:$0xff] %vm281_vm1, %v212_v30  ;;  %v218_v35 = vadd.f32 %v217_v34, %v1964_v41 }
 0x308   :  { %1661 = vtanh.f32 %v587_v63  ;;  %v586_v3 = vmul.f32 %v1660_v2, %v584_v1  ;;  %v592_v18 = vsub.f32 1.0, %v1660_v2  ;;  %v604_v20 = vmul.f32 %v1660_v2, %v1999_v33  ;;  %v44_v63 = vld [vmem:[%s2300_s0 + $0x30] sm:$0xff]  ;;  %v45_v1 = vld [vmem:[%s2300_s0 + $0x38] sm:$0xff] }
 0x309   :  { %v216_v33 = vadd.f32 %v215_v31, %v1962_v40  ;;  %292 = vst.msk [vmem:[#allocation2 + $0x58] sm:$0xff] %vm281_vm1, %v218_v35  ;;  %1458 = vmatmul.mubr.msk.f32.gmra.mrb[12].mxu0 %vm70_vm0, %v44_v63  ;;  %v51_v63 = vld [vmem:[%s2300_s0 + $0x68] sm:$0xff] }
 0x30a   :  { %v588_v6 = vadd.f32 %v586_v3, %v487_v5  ;;  %225 = vmatprep.mubr.f32.mxu0 %v1789_v0 }
 0x30c   :  { %1663 = vtanh.f32 %v588_v6 }
 0x30d   :  { %1459 = vmatmul.mubr.msk.f32.gmra.mrb[14].mxu0 %vm70_vm0, %v45_v1  ;;  %v52_v1 = vld [vmem:[%s2300_s0 + $0x70] sm:$0xff] }
 0x30e   :  { %v622_v55 = vld [vmem:[#allocation2 + $0x48] sm:$0xff]  ;;  %231 = vmatprep.mubr.f32.mxu0 %v1789_v0 }
 0x310   :  { %v624_v60 = vld [vmem:[#allocation2 + $0x58] sm:$0xff] }
 0x312   :  { %v1662_v10 = vpop.eup %1661 }
 0x313   :  { %595 = vrot.lane.b32.xlu0 %v1662_v10, %s1790_s28 }
 0x316   :  { %v1664_v11 = vpop.eup %1663 }
 0x317   :  { %597 = vrot.lane.b32.xlu1 %v1664_v11, %s1790_s28 }
 0x385   :  { %v596_v13 = vpop.permute.xlu0 %595 }
 0x386   :  { %v601_v15 = vmul.f32 %v596_v13, %v591_v12 }
 0x388   :  { %v2040_v17 = vadd.f32 %v603_v14, %v601_v15 }
 0x389   :  { %v598_v19 = vpop.permute.xlu1 %597 }
 0x38a   :  { %v602_v23 = vmul.f32 %v598_v19, %v592_v18  ;;  %609 = vrot.lane.b32.xlu0 %v2040_v17, %s1790_s28 }
 0x38c   :  { %v2045_v24 = vadd.f32 %v604_v20, %v602_v23 }
 0x38e   :  { %611 = vrot.lane.b32.xlu1 %v2045_v24, %s1790_s28 }
 0x3dc   :  { %v221_v18 = vpop.f32.mrb[12].mxu0 }
 0x3dd   :  { %v222_v19 = vadd.f32 %v221_v18, %v1962_v40 }
 0x3fc   :  { %v610_v36 = vpop.permute.xlu0 %609 }
 0x3fd   :  { %616 = vst.msk [vmem:[#allocation6 + $0x10] sm:$0xff] %vm477_vm2, %v610_v36  ;;  %1477 = vmatmul.mubr.msk.f32.vlgmr.msra.gmra.mrb[8].mxu1 %vm281_vm1, %v610_v36 }
 0x3fe   :  { %619 = vst.msk [vmem:[#allocation6 + $0x60] sm:$0xff] %vm481_vm3, %v610_v36  ;;  %699 = vmatprep.mubr.f32.mxu1 %v1789_v0  ;;  %1556 = vmatpush1.bf16.msra.mxu1 %v1857_v9 }
 0x3ff   :  { %1558 = vmatprep.subr.bf16.mxu1 %v1870_v16 }
 0x400   :  { %v612_v37 = vpop.permute.xlu1 %611 }
 0x401   :  { %617 = vst.msk [vmem:[#allocation6 + $0x18] sm:$0xff] %vm477_vm2, %v612_v37  ;;  %1478 = vmatmul.mubr.msk.f32.gmra.mrb[10].mxu1 %vm281_vm1, %v612_v37 }
 0x402   :  { %620 = vst.msk [vmem:[#allocation6 + $0x68] sm:$0xff] %vm481_vm3, %v612_v37  ;;  %1560 = vmatpush1.bf16.msra.mxu1 %v1884_v21  ;;  %830 = vmatprep.mubr.f32.mxu1 %v1789_v0 }
 0x403   :  { %1562 = vmatprep.subr.bf16.mxu1 %v1886_v22 }
 0x406   :  { %1564 = vmatpush1.bf16.msra.mxu1 %v1904_v27 }
 0x407   :  { %1566 = vmatprep.subr.bf16.mxu1 %v1911_v29 }
 0x40a   :  { %1568 = vmatpush1.bf16.msra.mxu1 %v1923_v32 }
 0x40b   :  { %1586 = vmatprep.subr.bf16.mxu1 %v1849_v4 }
 0x4d0   :  { %v695_v38 = vpop.f32.mrb[8].mxu1 }
 0x4d1   :  { %v706_v39 = vadd.f32 %v695_v38, %v210_v28  ;;  %v697_v42 = vpop.f32.mrb[9].mxu1 }
 0x4d2   :  { %v720_v52 = vadd.f32 %v1975_v62, %v697_v42 }
 0x4d3   :  { %v1479_v43 = vmul.f32 -1.442695, %v706_v39 }
 0x4d4   :  { %v701_v44 = vpop.f32.mrb[10].mxu1 }
 0x4d5   :  { %1665 = vpow2.f32 %v1479_v43  ;;  %v707_v45 = vadd.f32 %v701_v44, %v216_v33  ;;  %v703_v46 = vpop.f32.mrb[11].mxu1 }
 0x4d6   :  { %v721_v57 = vadd.f32 %v1975_v62, %v703_v46 }
 0x4d7   :  { %v1480_v47 = vmul.f32 -1.442695, %v707_v45 }
 0x4d9   :  { %1667 = vpow2.f32 %v1480_v47 }
 0x4df   :  { %v1666_v48 = vpop.eup %1665 }
 0x4e0   :  { %v714_v49 = vadd.f32 1.0, %v1666_v48 }
 0x4e2   :  { %1669 = vrcp.f32 %v714_v49 }
 0x4e3   :  { %v1668_v50 = vpop.eup %1667 }
 0x4e4   :  { %v715_v51 = vadd.f32 1.0, %v1668_v50 }
 0x4e6   :  { %1671 = vrcp.f32 %v715_v51 }
 0x4ec   :  { %v1670_v53 = vpop.eup %1669 }
 0x4ed   :  { %v722_v54 = vmul.f32 %v1670_v53, %v720_v52  ;;  %v728_v5 = vsub.f32 1.0, %v1670_v53  ;;  %v740_v7 = vmul.f32 %v1670_v53, %v2040_v17  ;;  %v223_v17 = vpop.f32.mrb[13].mxu0 }
 0x4ee   :  { %v224_v20 = vadd.f32 %v223_v17, %v1964_v41  ;;  %v227_v23 = vpop.f32.mrb[14].mxu0 }
 0x4ef   :  { %v724_v56 = vadd.f32 %v722_v54, %v622_v55  ;;  %v229_v25 = vpop.f32.mrb[15].mxu0  ;;  %v46_v55 = vld [vmem:[%s2300_s0 + $0x40] sm:$0xff] }
 0x4f0   :  { %v1672_v58 = vpop.eup %1671  ;;  %294 = vst.msk [vmem:[#allocation2 + $0x68] sm:$0xff] %vm281_vm1, %v224_v20  ;;  %v230_v28 = vadd.f32 %v229_v25, %v1964_v41  ;;  %1460 = vmatmul.mubr.msk.f32.gmra.mrb[16].mxu0 %vm70_vm0, %v46_v55 }
 0x4f1   :  { %1673 = vtanh.f32 %v724_v56  ;;  %v723_v59 = vmul.f32 %v1672_v58, %v721_v57  ;;  %v729_v11 = vsub.f32 1.0, %v1672_v58  ;;  %v741_v13 = vmul.f32 %v1672_v58, %v2045_v24  ;;  %237 = vmatprep.mubr.f32.mxu0 %v1789_v0  ;;  %v47_v56 = vld [vmem:[%s2300_s0 + $0x48] sm:$0xff]  ;;  %v48_v58 = vld [vmem:[%s2300_s0 + $0x50] sm:$0xff] }
 0x4f2   :  { %v228_v24 = vadd.f32 %v227_v23, %v1962_v40  ;;  %296 = vst.msk [vmem:[#allocation2 + $0x78] sm:$0xff] %vm281_vm1, %v230_v28 }
 0x4f3   :  { %v725_v61 = vadd.f32 %v723_v59, %v624_v60  ;;  %v49_v60 = vld [vmem:[%s2300_s0 + $0x58] sm:$0xff] }
 0x4f4   :  { %1461 = vmatmul.mubr.msk.f32.gmra.mrb[18].mxu0 %vm70_vm0, %v47_v56 }
 0x4f5   :  { %1675 = vtanh.f32 %v725_v61  ;;  %243 = vmatprep.mubr.f32.mxu0 %v1789_v0  ;;  %v50_v61 = vld [vmem:[%s2300_s0 + $0x60] sm:$0xff] }
 0x4f7   :  { %v759_v48 = vld [vmem:[#allocation2 + $0x68] sm:$0xff] }
 0x4f8   :  { %1462 = vmatmul.mubr.msk.f32.gmra.mrb[20].mxu0 %vm70_vm0, %v48_v58 }
 0x4f9   :  { %v761_v53 = vld [vmem:[#allocation2 + $0x78] sm:$0xff]  ;;  %249 = vmatprep.mubr.f32.mxu0 %v1789_v0 }
 0x4fb   :  { %v1674_v2 = vpop.eup %1673 }
 0x4fc   :  { %732 = vrot.lane.b32.xlu0 %v1674_v2, %s1790_s28  ;;  %1463 = vmatmul.mubr.msk.f32.gmra.mrb[22].mxu0 %vm70_vm0, %v49_v60  ;;  %v53_v2 = vld [vmem:[%s2300_s0 + $0x78] sm:$0xff] }
 0x4fd   :  { %255 = vmatprep.mubr.f32.mxu0 %v1789_v0 }
 0x4ff   :  { %v1676_v3 = vpop.eup %1675 }
 0x500   :  { %734 = vrot.lane.b32.xlu1 %v1676_v3, %s1790_s28  ;;  %1464 = vmatmul.mubr.msk.f32.gmra.mrb[24].mxu0 %vm70_vm0, %v50_v61 }
 0x501   :  { %261 = vmatprep.mubr.f32.mxu0 %v1789_v0 }
 0x504   :  { %1465 = vmatmul.mubr.msk.f32.gmra.mrb[26].mxu0 %vm70_vm0, %v51_v63 }
 0x505   :  { %267 = vmatprep.mubr.f32.mxu0 %v1789_v0 }
 0x508   :  { %1466 = vmatmul.mubr.msk.f32.gmra.mrb[28].mxu0 %vm70_vm0, %v52_v1 }
 0x509   :  { %273 = vmatprep.mubr.f32.mxu0 %v1789_v0 }
 0x50c   :  { %1467 = vmatmul.mubr.msk.f32.gmra.mrb[30].mxu0 %vm70_vm0, %v53_v2 }
 0x50d   :  { %967 = vmatprep.mubr.f32.mxu0 %v1789_v0 }
 0x56e   :  { %v733_v6 = vpop.permute.xlu0 %732 }
 0x56f   :  { %v738_v8 = vmul.f32 %v733_v6, %v728_v5 }
 0x571   :  { %v2086_v10 = vadd.f32 %v740_v7, %v738_v8 }
 0x572   :  { %v735_v12 = vpop.permute.xlu1 %734 }
 0x573   :  { %v739_v14 = vmul.f32 %v735_v12, %v729_v11  ;;  %746 = vrot.lane.b32.xlu0 %v2086_v10, %s1790_s28 }
 0x575   :  { %v2091_v15 = vadd.f32 %v741_v13, %v739_v14 }
 0x577   :  { %748 = vrot.lane.b32.xlu1 %v2091_v15, %s1790_s28 }
 0x5e5   :  { %v747_v26 = vpop.permute.xlu0 %746 }
 0x5e6   :  { %753 = vst.msk [vmem:[#allocation6 + $0x20] sm:$0xff] %vm477_vm2, %v747_v26  ;;  %1481 = vmatmul.mubr.msk.f32.vlgmr.msra.gmra.mrb[12].mxu1 %vm281_vm1, %v747_v26 }
 0x5e7   :  { %756 = vst.msk [vmem:[#allocation6 + $0x50] sm:$0xff] %vm481_vm3, %v747_v26  ;;  %836 = vmatprep.mubr.f32.mxu1 %v1789_v0  ;;  %1588 = vmatpush1.bf16.msra.mxu1 %v1857_v9 }
 0x5e8   :  { %1590 = vmatprep.subr.bf16.mxu1 %v1870_v16 }
 0x5e9   :  { %v749_v30 = vpop.permute.xlu1 %748 }
 0x5ea   :  { %754 = vst.msk [vmem:[#allocation6 + $0x28] sm:$0xff] %vm477_vm2, %v749_v30  ;;  %1482 = vmatmul.mubr.msk.f32.gmra.mrb[14].mxu1 %vm281_vm1, %v749_v30 }
 0x5eb   :  { %757 = vst.msk [vmem:[#allocation6 + $0x58] sm:$0xff] %vm481_vm3, %v749_v30  ;;  %1592 = vmatpush1.bf16.msra.mxu1 %v1884_v21  ;;  %1102 = vmatprep.mubr.f32.mxu1 %v1789_v0 }
 0x5ec   :  { %1594 = vmatprep.subr.bf16.mxu1 %v1886_v22 }
 0x5ef   :  { %1596 = vmatpush1.bf16.msra.mxu1 %v1904_v27 }
 0x5f0   :  { %1598 = vmatprep.subr.bf16.mxu1 %v1911_v29 }
 0x5f3   :  { %1600 = vmatpush1.bf16.msra.mxu1 %v1923_v32 }
 0x5f4   :  { %1618 = vmatprep.subr.bf16.mxu1 %v1849_v4 }
 0x6b9   :  { %v832_v31 = vpop.f32.mrb[12].mxu1 }
 0x6ba   :  { %v843_v33 = vadd.f32 %v832_v31, %v222_v19  ;;  %v834_v34 = vpop.f32.mrb[13].mxu1  ;;  %v233_v19 = vpop.f32.mrb[16].mxu0 }
 0x6bb   :  { %v857_v46 = vadd.f32 %v1975_v62, %v834_v34  ;;  %v234_v17 = vadd.f32 %v233_v19, %v1962_v40 }
 0x6bc   :  { %v1483_v35 = vmul.f32 -1.442695, %v843_v33 }
 0x6bd   :  { %v838_v36 = vpop.f32.mrb[14].mxu1 }
 0x6be   :  { %1677 = vpow2.f32 %v1483_v35  ;;  %v844_v37 = vadd.f32 %v838_v36, %v228_v24  ;;  %v840_v38 = vpop.f32.mrb[15].mxu1 }
 0x6bf   :  { %v858_v50 = vadd.f32 %v1975_v62, %v840_v38 }
 0x6c0   :  { %v1484_v39 = vmul.f32 -1.442695, %v844_v37 }
 0x6c2   :  { %1679 = vpow2.f32 %v1484_v39 }
 0x6c8   :  { %v1678_v42 = vpop.eup %1677 }
 0x6c9   :  { %v851_v43 = vadd.f32 1.0, %v1678_v42 }
 0x6cb   :  { %1681 = vrcp.f32 %v851_v43 }
 0x6cc   :  { %v1680_v44 = vpop.eup %1679 }
 0x6cd   :  { %v852_v45 = vadd.f32 1.0, %v1680_v44 }
 0x6cf   :  { %1683 = vrcp.f32 %v852_v45 }
 0x6d5   :  { %v1682_v47 = vpop.eup %1681 }
 0x6d6   :  { %v859_v4 = vmul.f32 %v1682_v47, %v857_v46  ;;  %v865_v3 = vsub.f32 1.0, %v1682_v47  ;;  %v877_v6 = vmul.f32 %v1682_v47, %v2086_v10  ;;  %v235_v10 = vpop.f32.mrb[17].mxu0 }
 0x6d7   :  { %v236_v20 = vadd.f32 %v235_v10, %v1964_v41  ;;  %v239_v23 = vpop.f32.mrb[18].mxu0 }
 0x6d8   :  { %v861_v49 = vadd.f32 %v859_v4, %v759_v48  ;;  %v241_v24 = vpop.f32.mrb[19].mxu0 }
 0x6d9   :  { %v1684_v51 = vpop.eup %1683  ;;  %298 = vst.msk [vmem:[#allocation2 + $0x88] sm:$0xff] %vm281_vm1, %v236_v20  ;;  %v242_v25 = vadd.f32 %v241_v24, %v1964_v41  ;;  %v245_v28 = vpop.f32.mrb[20].mxu0 }
 0x6da   :  { %1685 = vtanh.f32 %v861_v49  ;;  %v860_v52 = vmul.f32 %v1684_v51, %v858_v50  ;;  %v866_v11 = vsub.f32 1.0, %v1684_v51  ;;  %v878_v13 = vmul.f32 %v1684_v51, %v2091_v15  ;;  %v247_v30 = vpop.f32.mrb[21].mxu0 }
 0x6db   :  { %v240_v15 = vadd.f32 %v239_v23, %v1962_v40  ;;  %300 = vst.msk [vmem:[#allocation2 + $0x98] sm:$0xff] %vm281_vm1, %v242_v25  ;;  %v2178_v26 = vadd.f32 %v245_v28, %v1962_v40  ;;  %v248_v31 = vadd.f32 %v247_v30, %v1964_v41  ;;  %v251_v33 = vpop.f32.mrb[22].mxu0 }
 0x6dc   :  { %v862_v54 = vadd.f32 %v860_v52, %v761_v53  ;;  %v2183_v34 = vadd.f32 %v251_v33, %v1962_v40  ;;  %v253_v35 = vpop.f32.mrb[23].mxu0 }
 0x6dd   :  { %302 = vst.msk [vmem:[#allocation2 + $0xa8] sm:$0xff] %vm281_vm1, %v248_v31  ;;  %v254_v36 = vadd.f32 %v253_v35, %v1964_v41  ;;  %v257_v37 = vpop.f32.mrb[24].mxu0 }
 0x6de   :  { %1687 = vtanh.f32 %v862_v54  ;;  %v2188_v38 = vadd.f32 %v257_v37, %v1962_v40  ;;  %v259_v39 = vpop.f32.mrb[25].mxu0 }
 0x6df   :  { %304 = vst.msk [vmem:[#allocation2 + $0xb8] sm:$0xff] %vm281_vm1, %v254_v36  ;;  %v260_v42 = vadd.f32 %v259_v39, %v1964_v41  ;;  %v263_v43 = vpop.f32.mrb[26].mxu0 }
 0x6e0   :  { %v2193_v44 = vadd.f32 %v263_v43, %v1962_v40  ;;  %v265_v45 = vpop.f32.mrb[27].mxu0 }
 0x6e1   :  { %306 = vst.msk [vmem:[#allocation2 + $0xc8] sm:$0xff] %vm281_vm1, %v260_v42  ;;  %v266_v46 = vadd.f32 %v265_v45, %v1964_v41  ;;  %v269_v47 = vpop.f32.mrb[28].mxu0 }
 0x6e2   :  { %v2198_v4 = vadd.f32 %v269_v47, %v1962_v40  ;;  %v271_v48 = vpop.f32.mrb[29].mxu0 }
 0x6e3   :  { %308 = vst.msk [vmem:[#allocation2 + $0xd8] sm:$0xff] %vm281_vm1, %v266_v46  ;;  %v272_v50 = vadd.f32 %v271_v48, %v1964_v41  ;;  %v275_v51 = vpop.f32.mrb[30].mxu0 }
 0x6e4   :  { %v1686_v57 = vpop.eup %1685  ;;  %v2208_v52 = vadd.f32 %v275_v51, %v1962_v40  ;;  %v277_v53 = vpop.f32.mrb[31].mxu0 }
 0x6e5   :  { %869 = vrot.lane.b32.xlu0 %v1686_v57, %s1790_s28  ;;  %310 = vst.msk [vmem:[#allocation2 + $0xe8] sm:$0xff] %vm281_vm1, %v272_v50  ;;  %v278_v55 = vadd.f32 %v277_v53, %v1964_v41 }
 0x6e7   :  { %312 = vst.msk [vmem:[#allocation2 + $0xf8] sm:$0xff] %vm281_vm1, %v278_v55 }
 0x6e8   :  { %v1688_v59 = vpop.eup %1687 }
 0x6e9   :  { %871 = vrot.lane.b32.xlu1 %v1688_v59, %s1790_s28 }
 0x757   :  { %v870_v5 = vpop.permute.xlu0 %869 }
 0x758   :  { %v875_v7 = vmul.f32 %v870_v5, %v865_v3 }
 0x75a   :  { %v2162_v8 = vadd.f32 %v877_v6, %v875_v7 }
 0x75b   :  { %v872_v12 = vpop.permute.xlu1 %871 }
 0x75c   :  { %v876_v14 = vmul.f32 %v872_v12, %v866_v11  ;;  %883 = vrot.lane.b32.xlu0 %v2162_v8, %s1790_s28  ;;  %v896_v11 = vld [vmem:[#allocation2 + $0x88] sm:$0xff] }
 0x75e   :  { %v2167_v18 = vadd.f32 %v878_v13, %v876_v14 }
 0x760   :  { %885 = vrot.lane.b32.xlu1 %v2167_v18, %s1790_s28 }
 0x7ce   :  { %v884_v49 = vpop.permute.xlu0 %883 }
 0x7cf   :  { %890 = vst.msk [vmem:[#allocation6 + $0x30] sm:$0xff] %vm477_vm2, %v884_v49  ;;  %1485 = vmatmul.mubr.msk.f32.vlgmr.msra.gmra.mrb[32].mxu0 %vm281_vm1, %v884_v49 }
 0x7d0   :  { %893 = vst.msk [vmem:[#allocation6 + $0x40] sm:$0xff] %vm481_vm3, %v884_v49  ;;  %973 = vmatprep.mubr.f32.mxu0 %v1789_v0  ;;  %1604 = vmatpush1.bf16.msra.mxu0 %v1857_v9 }
 0x7d1   :  { %1606 = vmatprep.subr.bf16.mxu0 %v1870_v16 }
 0x7d2   :  { %v886_v54 = vpop.permute.xlu1 %885 }
 0x7d3   :  { %891 = vst.msk [vmem:[#allocation6 + $0x38] sm:$0xff] %vm477_vm2, %v886_v54  ;;  %1486 = vmatmul.mubr.msk.f32.gmra.mrb[34].mxu0 %vm281_vm1, %v886_v54 }
 0x7d4   :  { %894 = vst.msk [vmem:[#allocation6 + $0x48] sm:$0xff] %vm481_vm3, %v886_v54  ;;  %1608 = vmatpush1.bf16.msra.mxu0 %v1884_v21  ;;  %1237 = vmatprep.mubr.f32.mxu0 %v1789_v0  ;;  %v1033_v54 = vld [vmem:[#allocation2 + $0xb8] sm:$0xff] }
 0x7d5   :  { %1610 = vmatprep.subr.bf16.mxu0 %v1886_v22 }
 0x7d8   :  { %1612 = vmatpush1.bf16.msra.mxu0 %v1904_v27 }
 0x7d9   :  { %1614 = vmatprep.subr.bf16.mxu0 %v1911_v29 }
 0x7dc   :  { %1616 = vmatpush1.bf16.msra.mxu0 %v1923_v32 }
 0x8a2   :  { %v969_v40 = vpop.f32.mrb[32].mxu0 }
 0x8a3   :  { %v980_v41 = vadd.f32 %v969_v40, %v234_v17  ;;  %v971_v56 = vpop.f32.mrb[33].mxu0  ;;  %v898_v17 = vld [vmem:[#allocation2 + $0x98] sm:$0xff] }
 0x8a4   :  { %v994_v5 = vadd.f32 %v1975_v62, %v971_v56 }
 0x8a5   :  { %v1487_v57 = vmul.f32 -1.442695, %v980_v41 }
 0x8a6   :  { %v975_v58 = vpop.f32.mrb[34].mxu0 }
 0x8a7   :  { %1689 = vpow2.f32 %v1487_v57  ;;  %v981_v59 = vadd.f32 %v975_v58, %v240_v15  ;;  %v977_v60 = vpop.f32.mrb[35].mxu0 }
 0x8a8   :  { %v995_v13 = vadd.f32 %v1975_v62, %v977_v60 }
 0x8a9   :  { %v1488_v61 = vmul.f32 -1.442695, %v981_v59 }
 0x8ab   :  { %1691 = vpow2.f32 %v1488_v61 }
 0x8b1   :  { %v1690_v63 = vpop.eup %1689 }
 0x8b2   :  { %v988_v1 = vadd.f32 1.0, %v1690_v63 }
 0x8b4   :  { %1693 = vrcp.f32 %v988_v1 }
 0x8b5   :  { %v1692_v2 = vpop.eup %1691 }
 0x8b6   :  { %v989_v3 = vadd.f32 1.0, %v1692_v2 }
 0x8b8   :  { %1695 = vrcp.f32 %v989_v3 }
 0x8be   :  { %v1694_v6 = vpop.eup %1693 }
 0x8bf   :  { %v996_v7 = vmul.f32 %v1694_v6, %v994_v5  ;;  %v1002_v15 = vsub.f32 1.0, %v1694_v6  ;;  %v1014_v25 = vmul.f32 %v1694_v6, %v2162_v8 }
 0x8c1   :  { %v998_v12 = vadd.f32 %v996_v7, %v896_v11 }
 0x8c2   :  { %v1696_v14 = vpop.eup %1695 }
 0x8c3   :  { %1697 = vtanh.f32 %v998_v12  ;;  %v997_v19 = vmul.f32 %v1696_v14, %v995_v13  ;;  %v1003_v31 = vsub.f32 1.0, %v1696_v14  ;;  %v1015_v35 = vmul.f32 %v1696_v14, %v2167_v18 }
 0x8c5   :  { %v999_v10 = vadd.f32 %v997_v19, %v898_v17 }
 0x8c7   :  { %1699 = vtanh.f32 %v999_v10 }
 0x8cd   :  { %v1698_v20 = vpop.eup %1697 }
 0x8ce   :  { %1006 = vrot.lane.b32.xlu0 %v1698_v20, %s1790_s28 }
 0x8d1   :  { %v1700_v23 = vpop.eup %1699 }
 0x8d2   :  { %1008 = vrot.lane.b32.xlu1 %v1700_v23, %s1790_s28 }
 0x940   :  { %v1007_v24 = vpop.permute.xlu0 %1006 }
 0x941   :  { %v1012_v28 = vmul.f32 %v1007_v24, %v1002_v15 }
 0x943   :  { %v1016_v30 = vadd.f32 %v1014_v25, %v1012_v28 }
 0x944   :  { %v1009_v33 = vpop.permute.xlu1 %1008 }
 0x945   :  { %v1013_v36 = vmul.f32 %v1009_v33, %v1003_v31  ;;  %1020 = vrot.lane.b32.xlu0 %v1016_v30, %s1790_s28 }
 0x947   :  { %v1017_v37 = vadd.f32 %v1015_v35, %v1013_v36  ;;  %v1168_v36 = vld [vmem:[#allocation2 + $0xd8] sm:$0xff] }
 0x949   :  { %1022 = vrot.lane.b32.xlu1 %v1017_v37, %s1790_s28 }
 0x9b7   :  { %v1021_v39 = vpop.permute.xlu0 %1020 }
 0x9b8   :  { %1026 = vst.msk [vmem:[#allocation6 + $0x40] sm:$0xff] %vm477_vm2, %v1021_v39  ;;  %1489 = vmatmul.mubr.msk.f32.vlgmr.msra.gmra.mrb[16].mxu1 %vm281_vm1, %v1021_v39 }
 0x9b9   :  { %1028 = vst.msk [vmem:[#allocation6 + $0x30] sm:$0xff] %vm481_vm3, %v1021_v39  ;;  %1108 = vmatprep.mubr.f32.mxu1 %v1789_v0  ;;  %1620 = vmatpush1.bf16.msra.mxu1 %v1857_v9 }
 0x9ba   :  { %1622 = vmatprep.subr.bf16.mxu1 %v1870_v16 }
 0x9bb   :  { %v1023_v8 = vpop.permute.xlu1 %1022 }
 0x9bc   :  { %1027 = vst.msk [vmem:[#allocation6 + $0x48] sm:$0xff] %vm477_vm2, %v1023_v8  ;;  %1490 = vmatmul.mubr.msk.f32.gmra.mrb[18].mxu1 %vm281_vm1, %v1023_v8 }
 0x9bd   :  { %1029 = vst.msk [vmem:[#allocation6 + $0x38] sm:$0xff] %vm481_vm3, %v1023_v8  ;;  %1624 = vmatpush1.bf16.msra.mxu1 %v1884_v21  ;;  %1372 = vmatprep.mubr.f32.mxu1 %v1789_v0 }
 0x9be   :  { %1626 = vmatprep.subr.bf16.mxu1 %v1886_v22 }
 0x9c1   :  { %1628 = vmatpush1.bf16.msra.mxu1 %v1904_v27 }
 0x9c2   :  { %1630 = vmatprep.subr.bf16.mxu1 %v1911_v29 }
 0x9c5   :  { %1632 = vmatpush1.bf16.msra.mxu1 %v1923_v32 }
 0xa8b   :  { %v1104_v9 = vpop.f32.mrb[16].mxu1 }
 0xa8c   :  { %v1115_v16 = vadd.f32 %v1104_v9, %v2178_v26  ;;  %v1106_v18 = vpop.f32.mrb[17].mxu1  ;;  %v1031_v26 = vld [vmem:[#allocation2 + $0xa8] sm:$0xff] }
 0xa8d   :  { %v1129_v29 = vadd.f32 %v1975_v62, %v1106_v18 }
 0xa8e   :  { %v1491_v42 = vmul.f32 -1.442695, %v1115_v16 }
 0xa8f   :  { %v1110_v43 = vpop.f32.mrb[18].mxu1 }
 0xa90   :  { %1701 = vpow2.f32 %v1491_v42  ;;  %v1116_v45 = vadd.f32 %v1110_v43, %v2183_v34  ;;  %v1112_v21 = vpop.f32.mrb[19].mxu1 }
 0xa91   :  { %v1130_v51 = vadd.f32 %v1975_v62, %v1112_v21 }
 0xa92   :  { %v1492_v46 = vmul.f32 -1.442695, %v1116_v45 }
 0xa94   :  { %1703 = vpow2.f32 %v1492_v46 }
 0xa9a   :  { %v1702_v47 = vpop.eup %1701 }
 0xa9b   :  { %v1123_v22 = vadd.f32 1.0, %v1702_v47 }
 0xa9d   :  { %1705 = vrcp.f32 %v1123_v22 }
 0xa9e   :  { %v1704_v27 = vpop.eup %1703 }
 0xa9f   :  { %v1124_v48 = vadd.f32 1.0, %v1704_v27 }
 0xaa1   :  { %1707 = vrcp.f32 %v1124_v48 }
 0xaa7   :  { %v1706_v32 = vpop.eup %1705 }
 0xaa8   :  { %v1131_v49 = vmul.f32 %v1706_v32, %v1129_v29  ;;  %v1137_v56 = vsub.f32 1.0, %v1706_v32  ;;  %v1149_v58 = vmul.f32 %v1706_v32, %v1016_v30 }
 0xaaa   :  { %v1133_v50 = vadd.f32 %v1131_v49, %v1031_v26 }
 0xaab   :  { %v1708_v53 = vpop.eup %1707 }
 0xaac   :  { %1709 = vtanh.f32 %v1133_v50  ;;  %v1132_v34 = vmul.f32 %v1708_v53, %v1130_v51  ;;  %v1138_v61 = vsub.f32 1.0, %v1708_v53  ;;  %v1150_v1 = vmul.f32 %v1708_v53, %v1017_v37 }
 0xaae   :  { %v1134_v55 = vadd.f32 %v1132_v34, %v1033_v54 }
 0xab0   :  { %1711 = vtanh.f32 %v1134_v55 }
 0xab6   :  { %v1710_v40 = vpop.eup %1709 }
 0xab7   :  { %1141 = vrot.lane.b32.xlu0 %v1710_v40, %s1790_s28  ;;  %v1737_v40 = vld [vmem:[%s2304_s4] ss:$0 sm:$0xff]  ;;  %s1791_s4 = smov [#allocation6]  }
 0xab8   :  { %s1440_s29 = sshll.u32 %s1791_s4, 4  ;;  %s1441_s29 = int_to_ptr.vmem [resolvable:$true] %s1440_s29 }
 0xab9   :  { %s1760_s30 = scalar_lea.vmem %s1441_s29, 2048  ;;  %p1765_p9 = scmp.lt.s32.totalorder %s1441_s29, %s1441_s29 }
 0xaba   :  { %v1712_v41 = vpop.eup %1711  ;;  %p1761_p8 = scmp.ne.s32.totalorder %s1441_s29, %s1760_s30  ;;  %p1766_p10 = scmp.lt.s32.totalorder %s1760_s30, %s1760_s30 }
 0xabb   :  { %1143 = vrot.lane.b32.xlu1 %v1712_v41, %s1790_s28 }
 0xabc   :  { %p1767_p11 = por %p1766_p10, %p1765_p9 }
 0xabe   :  { %p1768_p12 = pnand %p1767_p11, %p1761_p8 }
 0xb29   :  { %v1142_v57 = vpop.permute.xlu0 %1141 }
 0xb2a   :  { %v1147_v59 = vmul.f32 %v1142_v57, %v1137_v56  ;;  %v1301_v57 = vld [vmem:[#allocation2 + $0xe8] sm:$0xff] }
 0xb2c   :  { %v1151_v60 = vadd.f32 %v1149_v58, %v1147_v59 }
 0xb2d   :  { %v1144_v63 = vpop.permute.xlu1 %1143 }
 0xb2e   :  { %v1148_v2 = vmul.f32 %v1144_v63, %v1138_v61  ;;  %1155 = vrot.lane.b32.xlu0 %v1151_v60, %s1790_s28  ;;  %v1303_v61 = vld [vmem:[#allocation2 + $0xf8] sm:$0xff] }
 0xb30   :  { %v1152_v3 = vadd.f32 %v1150_v1, %v1148_v2 }
 0xb32   :  { %1157 = vrot.lane.b32.xlu1 %v1152_v3, %s1790_s28 }
 0xba0   :  { %v1156_v5 = vpop.permute.xlu0 %1155 }
 0xba1   :  { %1161 = vst.msk [vmem:[#allocation6 + $0x50] sm:$0xff] %vm477_vm2, %v1156_v5  ;;  %1493 = vmatmul.mubr.msk.f32.vlgmr.msra.gmra.mrb[36].mxu0 %vm281_vm1, %v1156_v5 }
 0xba2   :  { %1163 = vst.msk [vmem:[#allocation6 + $0x20] sm:$0xff] %vm481_vm3, %v1156_v5  ;;  %1243 = vmatprep.mubr.f32.mxu0 %v1789_v0 }
 0xba4   :  { %v1158_v6 = vpop.permute.xlu1 %1157 }
 0xba5   :  { %1162 = vst.msk [vmem:[#allocation6 + $0x58] sm:$0xff] %vm477_vm2, %v1158_v6  ;;  %1494 = vmatmul.mubr.msk.f32.gmra.mrb[38].mxu0 %vm281_vm1, %v1158_v6 }
 0xba6   :  { %1164 = vst.msk [vmem:[#allocation6 + $0x28] sm:$0xff] %vm481_vm3, %v1158_v6 }
 0xc74   :  { %v1239_v7 = vpop.f32.mrb[36].mxu0 }
 0xc75   :  { %v1250_v11 = vadd.f32 %v1239_v7, %v2188_v38  ;;  %v1241_v12 = vpop.f32.mrb[37].mxu0  ;;  %v1166_v38 = vld [vmem:[#allocation2 + $0xc8] sm:$0xff] }
 0xc76   :  { %v1264_v25 = vadd.f32 %v1975_v62, %v1241_v12 }
 0xc77   :  { %v1495_v13 = vmul.f32 -1.442695, %v1250_v11 }
 0xc78   :  { %v1245_v14 = vpop.f32.mrb[38].mxu0 }
 0xc79   :  { %1713 = vpow2.f32 %v1495_v13  ;;  %v1251_v19 = vadd.f32 %v1245_v14, %v2193_v44  ;;  %v1247_v17 = vpop.f32.mrb[39].mxu0 }
 0xc7a   :  { %v1265_v33 = vadd.f32 %v1975_v62, %v1247_v17 }
 0xc7b   :  { %v1496_v10 = vmul.f32 -1.442695, %v1251_v19 }
 0xc7d   :  { %1715 = vpow2.f32 %v1496_v10 }
 0xc83   :  { %v1714_v20 = vpop.eup %1713 }
 0xc84   :  { %v1258_v23 = vadd.f32 1.0, %v1714_v20 }
 0xc86   :  { %1717 = vrcp.f32 %v1258_v23 }
 0xc87   :  { %v1716_v15 = vpop.eup %1715 }
 0xc88   :  { %v1259_v24 = vadd.f32 1.0, %v1716_v15 }
 0xc8a   :  { %1719 = vrcp.f32 %v1259_v24 }
 0xc90   :  { %v1718_v28 = vpop.eup %1717 }
 0xc91   :  { %v1266_v30 = vmul.f32 %v1718_v28, %v1264_v25  ;;  %v1272_v9 = vsub.f32 1.0, %v1718_v28  ;;  %v1284_v18 = vmul.f32 %v1718_v28, %v1151_v60 }
 0xc93   :  { %v1268_v31 = vadd.f32 %v1266_v30, %v1166_v38 }
 0xc94   :  { %v1720_v35 = vpop.eup %1719 }
 0xc95   :  { %1721 = vtanh.f32 %v1268_v31  ;;  %v1267_v44 = vmul.f32 %v1720_v35, %v1265_v33  ;;  %v1273_v45 = vsub.f32 1.0, %v1720_v35  ;;  %v1285_v62 = vmul.f32 %v1720_v35, %v1152_v3 }
 0xc97   :  { %v1269_v37 = vadd.f32 %v1267_v44, %v1168_v36 }
 0xc99   :  { %1723 = vtanh.f32 %v1269_v37 }
 0xc9f   :  { %v1722_v39 = vpop.eup %1721 }
 0xca0   :  { %1276 = vrot.lane.b32.xlu0 %v1722_v39, %s1790_s28 }
 0xca3   :  { %v1724_v8 = vpop.eup %1723 }
 0xca4   :  { %1278 = vrot.lane.b32.xlu1 %v1724_v8, %s1790_s28 }
 0xd12   :  { %v1277_v16 = vpop.permute.xlu0 %1276 }
 0xd13   :  { %v1282_v42 = vmul.f32 %v1277_v16, %v1272_v9 }
 0xd15   :  { %v1286_v43 = vadd.f32 %v1284_v18, %v1282_v42 }
 0xd16   :  { %v1279_v21 = vpop.permute.xlu1 %1278 }
 0xd17   :  { %v1283_v46 = vmul.f32 %v1279_v21, %v1273_v45  ;;  %1290 = vrot.lane.b32.xlu0 %v1286_v43, %s1790_s28 }
 0xd19   :  { %v1287_v47 = vadd.f32 %v1285_v62, %v1283_v46 }
 0xd1b   :  { %1292 = vrot.lane.b32.xlu1 %v1287_v47, %s1790_s28 }
 0xd89   :  { %v1291_v22 = vpop.permute.xlu0 %1290 }
 0xd8a   :  { %1296 = vst.msk [vmem:[#allocation6 + $0x60] sm:$0xff] %vm477_vm2, %v1291_v22  ;;  %1497 = vmatmul.mubr.msk.f32.vlgmr.msra.gmra.mrb[20].mxu1 %vm281_vm1, %v1291_v22 }
 0xd8b   :  { %1298 = vst.msk [vmem:[#allocation6 + $0x10] sm:$0xff] %vm481_vm3, %v1291_v22  ;;  %1378 = vmatprep.mubr.f32.mxu1 %v1789_v0 }
 0xd8d   :  { %v1293_v27 = vpop.permute.xlu1 %1292 }
 0xd8e   :  { %1297 = vst.msk [vmem:[#allocation6 + $0x68] sm:$0xff] %vm477_vm2, %v1293_v27  ;;  %1498 = vmatmul.mubr.msk.f32.gmra.mrb[22].mxu1 %vm281_vm1, %v1293_v27 }
 0xd8f   :  { %1299 = vst.msk [vmem:[#allocation6 + $0x18] sm:$0xff] %vm481_vm3, %v1293_v27 }
 0xe5d   :  { %v1374_v48 = vpop.f32.mrb[20].mxu1 }
 0xe5e   :  { %v1385_v29 = vadd.f32 %v1374_v48, %v2198_v4  ;;  %v1376_v32 = vpop.f32.mrb[21].mxu1 }
 0xe5f   :  { %v1399_v4 = vadd.f32 %v1737_v40, %v1376_v32 }
 0xe60   :  { %v1499_v49 = vmul.f32 -1.442695, %v1385_v29 }
 0xe61   :  { %v1380_v26 = vpop.f32.mrb[22].mxu1 }
 0xe62   :  { %1725 = vpow2.f32 %v1499_v49  ;;  %v1386_v50 = vadd.f32 %v1380_v26, %v2208_v52  ;;  %v1382_v51 = vpop.f32.mrb[23].mxu1 }
 0xe63   :  { %v1400_v59 = vadd.f32 %v1737_v40, %v1382_v51 }
 0xe64   :  { %v1500_v53 = vmul.f32 -1.442695, %v1386_v50 }
 0xe66   :  { %1727 = vpow2.f32 %v1500_v53 }
 0xe6c   :  { %v1726_v0 = vpop.eup %1725 }
 0xe6d   :  { %v1393_v34 = vadd.f32 1.0, %v1726_v0 }
 0xe6f   :  { %1729 = vrcp.f32 %v1393_v34 }
 0xe70   :  { %v1728_v54 = vpop.eup %1727 }
 0xe71   :  { %v1394_v55 = vadd.f32 1.0, %v1728_v54 }
 0xe73   :  { %1731 = vrcp.f32 %v1394_v55 }
 0xe79   :  { %v1730_v41 = vpop.eup %1729 }
 0xe7a   :  { %v1401_v56 = vmul.f32 %v1730_v41, %v1399_v4  ;;  %v1407_v3 = vsub.f32 1.0, %v1730_v41  ;;  %v1419_v6 = vmul.f32 %v1730_v41, %v1286_v43 }
 0xe7c   :  { %v1403_v58 = vadd.f32 %v1401_v56, %v1301_v57 }
 0xe7d   :  { %v1732_v52 = vpop.eup %1731 }
 0xe7e   :  { %1733 = vtanh.f32 %v1403_v58  ;;  %v1402_v60 = vmul.f32 %v1732_v52, %v1400_v59  ;;  %v1408_v12 = vsub.f32 1.0, %v1732_v52  ;;  %v1420_v14 = vmul.f32 %v1732_v52, %v1287_v47 }
 0xe80   :  { %v1404_v63 = vadd.f32 %v1402_v60, %v1303_v61 }
 0xe82   :  { %1735 = vtanh.f32 %v1404_v63 }
 0xe88   :  { %v1734_v1 = vpop.eup %1733 }
 0xe89   :  { %1411 = vrot.lane.b32.xlu0 %v1734_v1, %s1790_s28 }
 0xe8c   :  { %v1736_v2 = vpop.eup %1735 }
 0xe8d   :  { %1413 = vrot.lane.b32.xlu1 %v1736_v2, %s1790_s28 }
 0xefb   :  { %v1412_v5 = vpop.permute.xlu0 %1411 }
 0xefc   :  { %v1417_v7 = vmul.f32 %v1412_v5, %v1407_v3 }
 0xefe   :  { %v1421_v11 = vadd.f32 %v1419_v6, %v1417_v7 }
 0xeff   :  { %v1414_v13 = vpop.permute.xlu1 %1413 }
 0xf00   :  { %v1418_v19 = vmul.f32 %v1414_v13, %v1408_v12  ;;  %1425 = vrot.lane.b32.xlu0 %v1421_v11, %s1790_s28 }
 0xf02   :  { %v1422_v17 = vadd.f32 %v1420_v14, %v1418_v19 }
 0xf04   :  { %1427 = vrot.lane.b32.xlu1 %v1422_v17, %s1790_s28 }
 0xf72   :  { %v1426_v10 = vpop.permute.xlu0 %1425 }
 0xf73   :  { %1431 = vst.msk [vmem:[#allocation6 + $0x70] sm:$0xff] %vm477_vm2, %v1426_v10 }
 0xf74   :  { %1433 = vst.msk [vmem:[#allocation6] sm:$0xff] %vm481_vm3, %v1426_v10 }
 0xf76   :  { %v1428_v20 = vpop.permute.xlu1 %1427 }
 0xf77   :  { %1432 = vst.msk [vmem:[#allocation6 + $0x78] sm:$0xff] %vm477_vm2, %v1428_v20 }
 0xf78   :  { %1434 = vst.msk [vmem:[#allocation6 + $0x8] sm:$0xff] %vm481_vm3, %v1428_v20 }
 0xf79   :  { %1771 = shalt.err (!%p1768_p12)
}
 0xf7a   :  { %s1772_s8 = scalar_lea.hbm %s2306_s6, 2048 }
 0xf7b   :  { %p1773_p13 = scmp.ne.s32.totalorder %s2306_s6, %s1772_s8  ;;  %p1776_p0 = scmp.lt.u32.totalorder %s1772_s8, %s2306_s6 }
 0xf7d   :  { %p1778_p1 = pnand %p1776_p0, %p1773_p13 }
 0xf7f   :  { %1781 = shalt.err (!%p1778_p1)
}
 0xf80   :  { %s1792_s13 = smov 128   ;;  %s1793_s14 = smov 8  }
 0xf81   :  { %1446 = dma.vmem_to_hbm [thread:$0]  %s1441_s29, 2048, %s2306_s6, [#allocation5], %s1792_s13, %s1792_s13, %s1793_s14  }
 0xf82   :  { %1784 = dma.done.wait [#allocation5], 2048  }
 0xf83   :  { %1785 = vsyncadd [#allocation5], 4294965248 }
 0xf84   :  { %1450 = vsyncpa [#allocation4], 1 }
 0xf85   :  { %1451 = vsyncpa [#allocation5], 1 }

</bundles_post_ra>
